<compile_context>
chip_gen: v5e
topology: v5e:2x2
jax: 0.10.0
libtpu: 0.0.40
codegen_flags: <defaults>
</compile_context>

<pallas_src>
import math
import numpy as np
import jax
import jax.numpy as jnp
from jax.experimental import pallas as pl
from jax.experimental.pallas import tpu as pltpu


def _round_up(n, m):
    return ((n + m - 1) // m) * m


# ----------------------------- Pallas kernel ---------------------------------

def make_block_kernel(n_head: int, n_embd: int, seq_len: int, block_b: int, hid_tile: int):
    C = n_embd
    D = C // n_head
    T = seq_len
    Bt = block_b
    R = Bt * T
    HID = 4 * C
    n_hid_tiles = HID // hid_tile
    NEG = -1e30  # finite "minus infinity"

    def layer_norm(z, w_ref, b_ref):
        # F.layer_norm over last dim, eps=1e-5 (f32)
        mu = jnp.mean(z, axis=-1, keepdims=True)
        var = jnp.mean((z - mu) ** 2, axis=-1, keepdims=True)
        return (z - mu) * jax.lax.rsqrt(var + 1e-5) * w_ref[...] + b_ref[...]

    def gelu_exact(z):
        # nn.GELU() default = exact (erf-based) GELU
        return 0.5 * z * (1.0 + jax.lax.erf(z * (1.0 / math.sqrt(2.0))))

    def kernel(x_ref, ln1w, ln1b, wq, bq, wk, bk, wv, bv, wpr, bpr,
               ln2w, ln2b, wfc, bfc, wp2, bp2, o_ref,
               q_sc, k_sc, v_sc, acc_sc):
        # Flatten (Bt, T, C) -> (Bt*T, C): position-wise matmuls get M = Bt*T rows.
        x = x_ref[...].reshape(R, C)                                   # f32

        # ---- attention branch: x + proj(attn(ln_1(x))) ----
        h = layer_norm(x, ln1w, ln1b).astype(jnp.bfloat16)

        # Q/K/V as three separate matmuls (only one (R, C) f32 result live at a time),
        # cast to bf16 immediately and parked head-major in VMEM scratch so the
        # attention loop only needs dynamic *leading*-dim indexing.
        for wref, bref, dst in ((wq, bq, q_sc), (wk, bk, k_sc), (wv, bv, v_sc)):
            z = (jnp.dot(h, wref[...], preferred_element_type=jnp.float32)
                 + bref[...]).astype(jnp.bfloat16)                     # (R, C)
            for hh in range(n_head):                                   # static, tiny bodies
                dst[hh] = z[:, hh * D:(hh + 1) * D].reshape(Bt, T, D)

        row = jax.lax.broadcasted_iota(jnp.int32, (T, T), 0)
        col = jax.lax.broadcasted_iota(jnp.int32, (T, T), 1)
        causal = row >= col

        # Residual + proj bias seed the accumulator; each head adds
        # (attn_head @ W_proj_head) directly. No (R, C) head-output slab and no
        # lane-offset masked stores: all stores are full lane-dense (R, C) tiles.
        acc_sc[...] = x + bpr[...]

        @pl.loop(0, n_head)  # bounded liveness: one (Bt, T, T) score tile at a time
        def _attn(hh):
            qh = q_sc[hh]                                              # (Bt, T, D) bf16
            kh = k_sc[hh]
            vh = v_sc[hh]
            att = jnp.einsum("bqd,bkd->bqk", qh, kh,
                             preferred_element_type=jnp.float32)       # (Bt, T, T) f32
            att = jnp.where(causal[None], att, NEG)
            att = att - jnp.max(att, axis=-1, keepdims=True)
            p = jnp.exp(att)                                           # un-normalized probs
            l = jnp.sum(p, axis=-1, keepdims=True)
            oh = jnp.einsum("bqk,bkd->bqd", p.astype(jnp.bfloat16), vh,
                            preferred_element_type=jnp.float32)
            oh = oh * pl.reciprocal(l, approx=True)                    # normalize (T, D), EUP
            oh = oh.astype(jnp.bfloat16).reshape(R, D)
            acc_sc[...] += jnp.dot(oh, wpr[hh],                        # (D, C) row-block
                                   preferred_element_type=jnp.float32)

        x1 = acc_sc[...]                                               # (R, C) f32

        # ---- MLP branch: x1 + proj2(gelu(fc(ln_2(x1)))), tiled over 4C hidden ----
        h2 = layer_norm(x1, ln2w, ln2b).astype(jnp.bfloat16)
        acc_sc[...] = x1 + bp2[...]                                    # residual + final bias

        @pl.loop(0, n_hid_tiles)
        def _mlp(t):
            f = (jnp.dot(h2, wfc[t], preferred_element_type=jnp.float32)
                 + bfc[t])
            f = gelu_exact(f)
            acc_sc[...] += jnp.dot(f.astype(jnp.bfloat16), wp2[t],
                                   preferred_element_type=jnp.float32)

        o_ref[...] = acc_sc[...].reshape(Bt, T, C)

    return kernel


# ----------------------------- tiling heuristics ------------------------------

def _pick_hid_tile(hid, cap=512):
    if hid <= cap:
        return hid
    t = (cap // 128) * 128
    while t >= 128:
        if hid % t == 0:
            return t
        t -= 128
    return hid  # no 128-multiple divides hid: single tile (rare)


def _vmem_capacity_bytes():
    try:
        return int(pltpu.get_tpu_info().vmem_capacity_bytes)
    except Exception:
        return 64 * 1024 * 1024  # conservative default (v7x per-TC VMEM)


def _estimate_vmem_bytes(Bt, T, C, n_head, hid_tile, weight_bufs):
    """Rough per-grid-step VMEM footprint (bytes), including (8,128) padding."""
    D = C // n_head
    R = Bt * T
    Tp = _round_up(T, 8)
    Cp = _round_up(C, 128)
    Dp = _round_up(D, 128)
    Hp = _round_up(hid_tile, 128)
    H4 = _round_up(4 * C, 128)
    Rp = _round_up(R, 8)
    io = 2 * 2 * Bt * Tp * Cp * 4                                     # x + out, double-buffered
    weights = weight_bufs * 2 * (3 * C * Cp + C * Cp + C * H4 + 4 * C * Cp)   # bf16 matmul weights
    scratch = 3 * n_head * Bt * Tp * Dp * 2 + Rp * Cp * 4             # q/k/v bf16 + f32 accumulator
    live = 4 * Rp * Cp * 4 + 2 * Bt * Tp * _round_up(T, 128) * 4 + 2 * Rp * Hp * 4
    return io + weights + scratch + live


def _pick_block_b(B, T, C, n_head, hid_tile, budget, weight_bufs):
    cap = max(1, B // 2)  # >= 2 grid steps so both v7x TensorCores get work
    best = 1
    for bt in range(1, cap + 1):
        if B % bt != 0:
            continue
        if _estimate_vmem_bytes(bt, T, C, n_head, hid_tile, weight_bufs) <= budget:
            best = bt
    return best


# ------------------------------- wrapper --------------------------------------

def block_forward(x, params, n_head):
    B, T, C = x.shape
    D = C // n_head
    HID = 4 * C
    hid_tile = _pick_hid_tile(HID)
    n_hid_tiles = HID // hid_tile

    vmem_limit = min(_vmem_capacity_bytes(), 128 * 1024 * 1024)
    budget = int(vmem_limit * 0.75)  # leave headroom below the scoped limit

    scale = 1.0 / math.sqrt(D)
    wqkv, bqkv = params["w_qkv"], params["b_qkv"]

    # Big matmul weights -> bf16 (half VMEM, bf16 MXU rate); LN params & biases stay f32.
    # Pre-reshaped so the kernel only ever indexes leading dims dynamically.
    weights = [
        params["ln1_w"], params["ln1_b"],
        (wqkv[:, 0 * C:1 * C] * scale).astype(jnp.bfloat16),           # 1/sqrt(D) folded into Q
        bqkv[:, 0 * C:1 * C] * scale,
        wqkv[:, 1 * C:2 * C].astype(jnp.bfloat16),
        bqkv[:, 1 * C:2 * C],
        wqkv[:, 2 * C:3 * C].astype(jnp.bfloat16),
        bqkv[:, 2 * C:3 * C],
        params["w_proj"].reshape(n_head, D, C).astype(jnp.bfloat16),   # per-head row blocks
        params["b_proj"],
        params["ln2_w"], params["ln2_b"],
        params["w_fc"].reshape(C, n_hid_tiles, hid_tile).transpose(1, 0, 2).astype(jnp.bfloat16),
        params["b_fc"].reshape(n_hid_tiles, 1, hid_tile),
        params["w_proj2"].reshape(n_hid_tiles, hid_tile, C).astype(jnp.bfloat16),
        params["b_proj2"],
    ]

    def run(single_buffer_weights):
        weight_bufs = 1 if single_buffer_weights else 2
        Bt = _pick_block_b(B, T, C, n_head, hid_tile, budget, weight_bufs)
        R = Bt * T
        kernel = make_block_kernel(n_head, C, T, Bt, hid_tile)

        def w_spec(arr):
            nd = arr.ndim
            if single_buffer_weights:
                # grid-invariant block -> no double buffering needed
                return pl.BlockSpec(arr.shape, lambda b, _nd=nd: (0,) * _nd,
                                    pipeline_mode=pl.Buffered(1))
            return pl.BlockSpec(arr.shape, lambda b, _nd=nd: (0,) * _nd)

        in_specs = ([pl.BlockSpec((Bt, T, C), lambda b: (b, 0, 0))]
                    + [w_spec(w) for w in weights])
        out_specs = pl.BlockSpec((Bt, T, C), lambda b: (b, 0, 0))

        return pl.pallas_call(
            kernel,
            out_shape=jax.ShapeDtypeStruct((B, T, C), jnp.float32),
            grid_spec=pltpu.PrefetchScalarGridSpec(
                num_scalar_prefetch=0,
                grid=(B // Bt,),
                in_specs=in_specs,
                out_specs=out_specs,
                scratch_shapes=[
                    pltpu.VMEM((n_head, Bt, T, D), jnp.bfloat16),      # Q (head-major)
                    pltpu.VMEM((n_head, Bt, T, D), jnp.bfloat16),      # K
                    pltpu.VMEM((n_head, Bt, T, D), jnp.bfloat16),      # V
                    pltpu.VMEM((R, C), jnp.float32),                   # shared f32 accumulator
                ],
            ),
            compiler_params=pltpu.CompilerParams(
                dimension_semantics=("parallel",),
                vmem_limit_bytes=vmem_limit,
            ),
        )(x, *weights)

    try:
        out = run(single_buffer_weights=True)
        jax.block_until_ready(out)
        return out
    except Exception:
        # TODO(synk): pl.Buffered(1) single-buffering rejected by this jax/Mosaic version;
        # fall back to default double-buffered weight blocks.
        return run(single_buffer_weights=False)


# --------------------------- pure-JAX reference -------------------------------

def block_ref(x, p, n_head):
    B, T, C = x.shape
    D = C // n_head

    def ln(z, w, b):
        mu = z.mean(-1, keepdims=True)
        var = ((z - mu) ** 2).mean(-1, keepdims=True)
        return (z - mu) / jnp.sqrt(var + 1e-5) * w + b

    h = ln(x, p["ln1_w"], p["ln1_b"])
    qkv = h @ p["w_qkv"] + p["b_qkv"]
    q, k, v = jnp.split(qkv, 3, axis=-1)
    q = q.reshape(B, T, n_head, D).transpose(0, 2, 1, 3)
    k = k.reshape(B, T, n_head, D).transpose(0, 2, 1, 3)
    v = v.reshape(B, T, n_head, D).transpose(0, 2, 1, 3)
    att = jnp.einsum("bhqd,bhkd->bhqk", q, k) / math.sqrt(D)
    mask = jnp.tril(jnp.ones((T, T), bool))
    att = jnp.where(mask[None, None], att, -jnp.inf)
    att = jax.nn.softmax(att, axis=-1)
    y = jnp.einsum("bhqk,bhkd->bhqd", att, v)
    y = y.transpose(0, 2, 1, 3).reshape(B, T, C)
    x1 = x + (y @ p["w_proj"] + p["b_proj"])

    h2 = ln(x1, p["ln2_w"], p["ln2_b"])
    f = jax.nn.gelu(h2 @ p["w_fc"] + p["b_fc"], approximate=False)
    return x1 + (f @ p["w_proj2"] + p["b_proj2"])


# ------------------------------------ main ------------------------------------

if __name__ == "__main__":
    # Small smoke-test shapes; tune at realistic sizes (T>=128, C multiple of 128, D in {64,128}).
    B, T, C, H = 2, 8, 32, 4  # batch, seq, n_embd, n_head
    key = jax.random.PRNGKey(0)
    keys = jax.random.split(key, 10)

    # Weights pre-transposed to "x @ W" layout; biases stored as (1, dim) 2-D arrays.
    params = {
        "ln1_w": jnp.ones((1, C), jnp.float32),
        "ln1_b": jnp.zeros((1, C), jnp.float32),
        "w_qkv": 0.02 * jax.random.normal(keys[0], (C, 3 * C), jnp.float32),
        "b_qkv": 0.02 * jax.random.normal(keys[1], (1, 3 * C), jnp.float32),
        "w_proj": 0.02 * jax.random.normal(keys[2], (C, C), jnp.float32),
        "b_proj": 0.02 * jax.random.normal(keys[3], (1, C), jnp.float32),
        "ln2_w": jnp.ones((1, C), jnp.float32),
        "ln2_b": jnp.zeros((1, C), jnp.float32),
        "w_fc": 0.02 * jax.random.normal(keys[4], (C, 4 * C), jnp.float32),
        "b_fc": 0.02 * jax.random.normal(keys[5], (1, 4 * C), jnp.float32),
        "w_proj2": 0.02 * jax.random.normal(keys[6], (4 * C, C), jnp.float32),
        "b_proj2": 0.02 * jax.random.normal(keys[7], (1, C), jnp.float32),
    }

    x = jax.random.normal(keys[8], (B, T, C), jnp.float32)

    out = block_forward(x, params, n_head=H)
    jax.block_until_ready(out)

    ref = block_ref(x, params, n_head=H)
    # bf16 MXU inputs + approx reciprocal -> looser tolerance than pure-f32.
    np.testing.assert_allclose(np.asarray(out), np.asarray(ref), rtol=2e-2, atol=2e-2)

    print("KERNEL_OK")
</pallas_src>

<mosaic_0001>
module attributes {stable_mosaic.version = 11 : i64} {
  func.func @kernel(%arg0: i32, %arg1: memref<1x8x32xf32, #tpu.memory_space<vmem>>, %arg2: memref<1x32xf32, #tpu.memory_space<vmem>>, %arg3: memref<1x32xf32, #tpu.memory_space<vmem>>, %arg4: memref<32x32xbf16, #tpu.memory_space<vmem>>, %arg5: memref<1x32xf32, #tpu.memory_space<vmem>>, %arg6: memref<32x32xbf16, #tpu.memory_space<vmem>>, %arg7: memref<1x32xf32, #tpu.memory_space<vmem>>, %arg8: memref<32x32xbf16, #tpu.memory_space<vmem>>, %arg9: memref<1x32xf32, #tpu.memory_space<vmem>>, %arg10: memref<4x8x32xbf16, #tpu.memory_space<vmem>>, %arg11: memref<1x32xf32, #tpu.memory_space<vmem>>, %arg12: memref<1x32xf32, #tpu.memory_space<vmem>>, %arg13: memref<1x32xf32, #tpu.memory_space<vmem>>, %arg14: memref<1x32x128xbf16, #tpu.memory_space<vmem>>, %arg15: memref<1x1x128xf32, #tpu.memory_space<vmem>>, %arg16: memref<1x128x32xbf16, #tpu.memory_space<vmem>>, %arg17: memref<1x32xf32, #tpu.memory_space<vmem>>, %arg18: memref<1x8x32xf32, #tpu.memory_space<vmem>>, %arg19: memref<4x1x8x8xbf16, #tpu.memory_space<vmem>>, %arg20: memref<4x1x8x8xbf16, #tpu.memory_space<vmem>>, %arg21: memref<4x1x8x8xbf16, #tpu.memory_space<vmem>>, %arg22: memref<8x32xf32, #tpu.memory_space<vmem>>) attributes {dimension_semantics = [#tpu.dimension_semantics<parallel>], iteration_bounds = array<i64: 2>, scalar_prefetch = 0 : i64, scratch_operands = 4 : i64, tpu.core_type = #tpu.core_type<tc>, window_params = [{transform_indices = @transform_0, window_bounds = array<i64: 1, 8, 32>}, {pipeline_mode = #tpu.pipeline_mode<synchronous>, transform_indices = @transform_1, window_bounds = array<i64: 1, 32>}, {pipeline_mode = #tpu.pipeline_mode<synchronous>, transform_indices = @transform_2, window_bounds = array<i64: 1, 32>}, {pipeline_mode = #tpu.pipeline_mode<synchronous>, transform_indices = @transform_3, window_bounds = array<i64: 32, 32>}, {pipeline_mode = #tpu.pipeline_mode<synchronous>, transform_indices = @transform_4, window_bounds = array<i64: 1, 32>}, {pipeline_mode = #tpu.pipeline_mode<synchronous>, transform_indices = @transform_5, window_bounds = array<i64: 32, 32>}, {pipeline_mode = #tpu.pipeline_mode<synchronous>, transform_indices = @transform_6, window_bounds = array<i64: 1, 32>}, {pipeline_mode = #tpu.pipeline_mode<synchronous>, transform_indices = @transform_7, window_bounds = array<i64: 32, 32>}, {pipeline_mode = #tpu.pipeline_mode<synchronous>, transform_indices = @transform_8, window_bounds = array<i64: 1, 32>}, {pipeline_mode = #tpu.pipeline_mode<synchronous>, transform_indices = @transform_9, window_bounds = array<i64: 4, 8, 32>}, {pipeline_mode = #tpu.pipeline_mode<synchronous>, transform_indices = @transform_10, window_bounds = array<i64: 1, 32>}, {pipeline_mode = #tpu.pipeline_mode<synchronous>, transform_indices = @transform_11, window_bounds = array<i64: 1, 32>}, {pipeline_mode = #tpu.pipeline_mode<synchronous>, transform_indices = @transform_12, window_bounds = array<i64: 1, 32>}, {pipeline_mode = #tpu.pipeline_mode<synchronous>, transform_indices = @transform_13, window_bounds = array<i64: 1, 32, 128>}, {pipeline_mode = #tpu.pipeline_mode<synchronous>, transform_indices = @transform_14, window_bounds = array<i64: 1, 1, 128>}, {pipeline_mode = #tpu.pipeline_mode<synchronous>, transform_indices = @transform_15, window_bounds = array<i64: 1, 128, 32>}, {pipeline_mode = #tpu.pipeline_mode<synchronous>, transform_indices = @transform_16, window_bounds = array<i64: 1, 32>}, {transform_indices = @transform_17, window_bounds = array<i64: 1, 8, 32>}]} {
    %c0 = arith.constant 0 : index
    %c0_0 = arith.constant 0 : index
    %c0_1 = arith.constant 0 : index
    %0 = vector.load %arg1[%c0, %c0_0, %c0_1] : memref<1x8x32xf32, #tpu.memory_space<vmem>>, vector<1x8x32xf32>
    %1 = vector.shape_cast %0 : vector<1x8x32xf32> to vector<8x32xf32>
    %cst = arith.constant dense<0.000000e+00> : vector<8xf32>
    %2 = vector.multi_reduction <add>, %1, %cst [1] : vector<8x32xf32> to vector<8xf32>
    %3 = vector.shape_cast %2 : vector<8xf32> to vector<8x1xf32>
    %cst_2 = arith.constant 3.200000e+01 : f32
    %4 = vector.broadcast %cst_2 : f32 to vector<8x1xf32>
    %5 = arith.divf %3, %4 : vector<8x1xf32>
    %6 = vector.broadcast %5 : vector<8x1xf32> to vector<8x32xf32>
    %7 = arith.subf %1, %6 : vector<8x32xf32>
    %8 = arith.mulf %7, %7 : vector<8x32xf32>
    %cst_3 = arith.constant dense<0.000000e+00> : vector<8xf32>
    %9 = vector.multi_reduction <add>, %8, %cst_3 [1] : vector<8x32xf32> to vector<8xf32>
    %10 = vector.shape_cast %9 : vector<8xf32> to vector<8x1xf32>
    %cst_4 = arith.constant 3.200000e+01 : f32
    %11 = vector.broadcast %cst_4 : f32 to vector<8x1xf32>
    %12 = arith.divf %10, %11 : vector<8x1xf32>
    %13 = vector.broadcast %5 : vector<8x1xf32> to vector<8x32xf32>
    %14 = arith.subf %1, %13 : vector<8x32xf32>
    %cst_5 = arith.constant 9.99999974E-6 : f32
    %15 = vector.broadcast %cst_5 : f32 to vector<8x1xf32>
    %16 = arith.addf %12, %15 : vector<8x1xf32>
    %17 = math.rsqrt %16 : vector<8x1xf32>
    %18 = vector.broadcast %17 : vector<8x1xf32> to vector<8x32xf32>
    %19 = arith.mulf %14, %18 : vector<8x32xf32>
    %c0_6 = arith.constant 0 : index
    %c0_7 = arith.constant 0 : index
    %20 = vector.load %arg2[%c0_6, %c0_7] : memref<1x32xf32, #tpu.memory_space<vmem>>, vector<1x32xf32>
    %21 = vector.broadcast %20 : vector<1x32xf32> to vector<8x32xf32>
    %22 = arith.mulf %19, %21 : vector<8x32xf32>
    %c0_8 = arith.constant 0 : index
    %c0_9 = arith.constant 0 : index
    %23 = vector.load %arg3[%c0_8, %c0_9] : memref<1x32xf32, #tpu.memory_space<vmem>>, vector<1x32xf32>
    %24 = vector.broadcast %23 : vector<1x32xf32> to vector<8x32xf32>
    %25 = arith.addf %22, %24 : vector<8x32xf32>
    %26 = arith.truncf %25 : vector<8x32xf32> to vector<8x32xbf16>
    %c0_10 = arith.constant 0 : index
    %c0_11 = arith.constant 0 : index
    %27 = vector.load %arg4[%c0_10, %c0_11] : memref<32x32xbf16, #tpu.memory_space<vmem>>, vector<32x32xbf16>
    %cst_12 = arith.constant dense<0.000000e+00> : vector<8x32xf32>
    %28 = tpu.matmul %26, %27, %cst_12 {dimension_numbers = #tpu.dot_dimension_numbers<[1], [0], [0], [1], [0, 0, 1, 1], [], []>} : vector<8x32xbf16>, vector<32x32xbf16>, vector<8x32xf32> -> vector<8x32xf32>
    %c0_13 = arith.constant 0 : index
    %c0_14 = arith.constant 0 : index
    %29 = vector.load %arg5[%c0_13, %c0_14] : memref<1x32xf32, #tpu.memory_space<vmem>>, vector<1x32xf32>
    %30 = vector.broadcast %29 : vector<1x32xf32> to vector<8x32xf32>
    %31 = arith.addf %28, %30 : vector<8x32xf32>
    %32 = arith.truncf %31 : vector<8x32xf32> to vector<8x32xbf16>
    %33 = vector.extract_strided_slice %32 {offsets = [0, 0], sizes = [8, 8], strides = [1, 1]} : vector<8x32xbf16> to vector<8x8xbf16>
    %34 = vector.shape_cast %33 : vector<8x8xbf16> to vector<1x8x8xbf16>
    %c0_15 = arith.constant 0 : index
    %c0_16 = arith.constant 0 : index
    %c0_17 = arith.constant 0 : index
    %c0_18 = arith.constant 0 : index
    %35 = vector.load %arg19[%c0_15, %c0_16, %c0_17, %c0_18] : memref<4x1x8x8xbf16, #tpu.memory_space<vmem>>, vector<1x1x8x8xbf16>
    %36 = vector.shape_cast %35 : vector<1x1x8x8xbf16> to vector<1x8x8xbf16>
    %37 = vector.shape_cast %34 : vector<1x8x8xbf16> to vector<1x1x8x8xbf16>
    tpu.vector_store %arg19[%c0_15, %c0_16, %c0_17, %c0_18], %37 {strides = array<i32>} : memref<4x1x8x8xbf16, #tpu.memory_space<vmem>>, vector<1x1x8x8xbf16>,
    %38 = vector.extract_strided_slice %32 {offsets = [0, 8], sizes = [8, 8], strides = [1, 1]} : vector<8x32xbf16> to vector<8x8xbf16>
    %39 = vector.shape_cast %38 : vector<8x8xbf16> to vector<1x8x8xbf16>
    %c1 = arith.constant 1 : index
    %c0_19 = arith.constant 0 : index
    %c0_20 = arith.constant 0 : index
    %c0_21 = arith.constant 0 : index
    %40 = vector.load %arg19[%c1, %c0_19, %c0_20, %c0_21] : memref<4x1x8x8xbf16, #tpu.memory_space<vmem>>, vector<1x1x8x8xbf16>
    %41 = vector.shape_cast %40 : vector<1x1x8x8xbf16> to vector<1x8x8xbf16>
    %42 = vector.shape_cast %39 : vector<1x8x8xbf16> to vector<1x1x8x8xbf16>
    tpu.vector_store %arg19[%c1, %c0_19, %c0_20, %c0_21], %42 {strides = array<i32>} : memref<4x1x8x8xbf16, #tpu.memory_space<vmem>>, vector<1x1x8x8xbf16>,
    %43 = vector.extract_strided_slice %32 {offsets = [0, 16], sizes = [8, 8], strides = [1, 1]} : vector<8x32xbf16> to vector<8x8xbf16>
    %44 = vector.shape_cast %43 : vector<8x8xbf16> to vector<1x8x8xbf16>
    %c2 = arith.constant 2 : index
    %c0_22 = arith.constant 0 : index
    %c0_23 = arith.constant 0 : index
    %c0_24 = arith.constant 0 : index
    %45 = vector.load %arg19[%c2, %c0_22, %c0_23, %c0_24] : memref<4x1x8x8xbf16, #tpu.memory_space<vmem>>, vector<1x1x8x8xbf16>
    %46 = vector.shape_cast %45 : vector<1x1x8x8xbf16> to vector<1x8x8xbf16>
    %47 = vector.shape_cast %44 : vector<1x8x8xbf16> to vector<1x1x8x8xbf16>
    tpu.vector_store %arg19[%c2, %c0_22, %c0_23, %c0_24], %47 {strides = array<i32>} : memref<4x1x8x8xbf16, #tpu.memory_space<vmem>>, vector<1x1x8x8xbf16>,
    %48 = vector.extract_strided_slice %32 {offsets = [0, 24], sizes = [8, 8], strides = [1, 1]} : vector<8x32xbf16> to vector<8x8xbf16>
    %49 = vector.shape_cast %48 : vector<8x8xbf16> to vector<1x8x8xbf16>
    %c3 = arith.constant 3 : index
    %c0_25 = arith.constant 0 : index
    %c0_26 = arith.constant 0 : index
    %c0_27 = arith.constant 0 : index
    %50 = vector.load %arg19[%c3, %c0_25, %c0_26, %c0_27] : memref<4x1x8x8xbf16, #tpu.memory_space<vmem>>, vector<1x1x8x8xbf16>
    %51 = vector.shape_cast %50 : vector<1x1x8x8xbf16> to vector<1x8x8xbf16>
    %52 = vector.shape_cast %49 : vector<1x8x8xbf16> to vector<1x1x8x8xbf16>
    tpu.vector_store %arg19[%c3, %c0_25, %c0_26, %c0_27], %52 {strides = array<i32>} : memref<4x1x8x8xbf16, #tpu.memory_space<vmem>>, vector<1x1x8x8xbf16>,
    %c0_28 = arith.constant 0 : index
    %c0_29 = arith.constant 0 : index
    %53 = vector.load %arg6[%c0_28, %c0_29] : memref<32x32xbf16, #tpu.memory_space<vmem>>, vector<32x32xbf16>
    %cst_30 = arith.constant dense<0.000000e+00> : vector<8x32xf32>
    %54 = tpu.matmul %26, %53, %cst_30 {dimension_numbers = #tpu.dot_dimension_numbers<[1], [0], [0], [1], [0, 0, 1, 1], [], []>} : vector<8x32xbf16>, vector<32x32xbf16>, vector<8x32xf32> -> vector<8x32xf32>
    %c0_31 = arith.constant 0 : index
    %c0_32 = arith.constant 0 : index
    %55 = vector.load %arg7[%c0_31, %c0_32] : memref<1x32xf32, #tpu.memory_space<vmem>>, vector<1x32xf32>
    %56 = vector.broadcast %55 : vector<1x32xf32> to vector<8x32xf32>
    %57 = arith.addf %54, %56 : vector<8x32xf32>
    %58 = arith.truncf %57 : vector<8x32xf32> to vector<8x32xbf16>
    %59 = vector.extract_strided_slice %58 {offsets = [0, 0], sizes = [8, 8], strides = [1, 1]} : vector<8x32xbf16> to vector<8x8xbf16>
    %60 = vector.shape_cast %59 : vector<8x8xbf16> to vector<1x8x8xbf16>
    %c0_33 = arith.constant 0 : index
    %c0_34 = arith.constant 0 : index
    %c0_35 = arith.constant 0 : index
    %c0_36 = arith.constant 0 : index
    %61 = vector.load %arg20[%c0_33, %c0_34, %c0_35, %c0_36] : memref<4x1x8x8xbf16, #tpu.memory_space<vmem>>, vector<1x1x8x8xbf16>
    %62 = vector.shape_cast %61 : vector<1x1x8x8xbf16> to vector<1x8x8xbf16>
    %63 = vector.shape_cast %60 : vector<1x8x8xbf16> to vector<1x1x8x8xbf16>
    tpu.vector_store %arg20[%c0_33, %c0_34, %c0_35, %c0_36], %63 {strides = array<i32>} : memref<4x1x8x8xbf16, #tpu.memory_space<vmem>>, vector<1x1x8x8xbf16>,
    %64 = vector.extract_strided_slice %58 {offsets = [0, 8], sizes = [8, 8], strides = [1, 1]} : vector<8x32xbf16> to vector<8x8xbf16>
    %65 = vector.shape_cast %64 : vector<8x8xbf16> to vector<1x8x8xbf16>
    %c1_37 = arith.constant 1 : index
    %c0_38 = arith.constant 0 : index
    %c0_39 = arith.constant 0 : index
    %c0_40 = arith.constant 0 : index
    %66 = vector.load %arg20[%c1_37, %c0_38, %c0_39, %c0_40] : memref<4x1x8x8xbf16, #tpu.memory_space<vmem>>, vector<1x1x8x8xbf16>
    %67 = vector.shape_cast %66 : vector<1x1x8x8xbf16> to vector<1x8x8xbf16>
    %68 = vector.shape_cast %65 : vector<1x8x8xbf16> to vector<1x1x8x8xbf16>
    tpu.vector_store %arg20[%c1_37, %c0_38, %c0_39, %c0_40], %68 {strides = array<i32>} : memref<4x1x8x8xbf16, #tpu.memory_space<vmem>>, vector<1x1x8x8xbf16>,
    %69 = vector.extract_strided_slice %58 {offsets = [0, 16], sizes = [8, 8], strides = [1, 1]} : vector<8x32xbf16> to vector<8x8xbf16>
    %70 = vector.shape_cast %69 : vector<8x8xbf16> to vector<1x8x8xbf16>
    %c2_41 = arith.constant 2 : index
    %c0_42 = arith.constant 0 : index
    %c0_43 = arith.constant 0 : index
    %c0_44 = arith.constant 0 : index
    %71 = vector.load %arg20[%c2_41, %c0_42, %c0_43, %c0_44] : memref<4x1x8x8xbf16, #tpu.memory_space<vmem>>, vector<1x1x8x8xbf16>
    %72 = vector.shape_cast %71 : vector<1x1x8x8xbf16> to vector<1x8x8xbf16>
    %73 = vector.shape_cast %70 : vector<1x8x8xbf16> to vector<1x1x8x8xbf16>
    tpu.vector_store %arg20[%c2_41, %c0_42, %c0_43, %c0_44], %73 {strides = array<i32>} : memref<4x1x8x8xbf16, #tpu.memory_space<vmem>>, vector<1x1x8x8xbf16>,
    %74 = vector.extract_strided_slice %58 {offsets = [0, 24], sizes = [8, 8], strides = [1, 1]} : vector<8x32xbf16> to vector<8x8xbf16>
    %75 = vector.shape_cast %74 : vector<8x8xbf16> to vector<1x8x8xbf16>
    %c3_45 = arith.constant 3 : index
    %c0_46 = arith.constant 0 : index
    %c0_47 = arith.constant 0 : index
    %c0_48 = arith.constant 0 : index
    %76 = vector.load %arg20[%c3_45, %c0_46, %c0_47, %c0_48] : memref<4x1x8x8xbf16, #tpu.memory_space<vmem>>, vector<1x1x8x8xbf16>
    %77 = vector.shape_cast %76 : vector<1x1x8x8xbf16> to vector<1x8x8xbf16>
    %78 = vector.shape_cast %75 : vector<1x8x8xbf16> to vector<1x1x8x8xbf16>
    tpu.vector_store %arg20[%c3_45, %c0_46, %c0_47, %c0_48], %78 {strides = array<i32>} : memref<4x1x8x8xbf16, #tpu.memory_space<vmem>>, vector<1x1x8x8xbf16>,
    %c0_49 = arith.constant 0 : index
    %c0_50 = arith.constant 0 : index
    %79 = vector.load %arg8[%c0_49, %c0_50] : memref<32x32xbf16, #tpu.memory_space<vmem>>, vector<32x32xbf16>
    %cst_51 = arith.constant dense<0.000000e+00> : vector<8x32xf32>
    %80 = tpu.matmul %26, %79, %cst_51 {dimension_numbers = #tpu.dot_dimension_numbers<[1], [0], [0], [1], [0, 0, 1, 1], [], []>} : vector<8x32xbf16>, vector<32x32xbf16>, vector<8x32xf32> -> vector<8x32xf32>
    %c0_52 = arith.constant 0 : index
    %c0_53 = arith.constant 0 : index
    %81 = vector.load %arg9[%c0_52, %c0_53] : memref<1x32xf32, #tpu.memory_space<vmem>>, vector<1x32xf32>
    %82 = vector.broadcast %81 : vector<1x32xf32> to vector<8x32xf32>
    %83 = arith.addf %80, %82 : vector<8x32xf32>
    %84 = arith.truncf %83 : vector<8x32xf32> to vector<8x32xbf16>
    %85 = vector.extract_strided_slice %84 {offsets = [0, 0], sizes = [8, 8], strides = [1, 1]} : vector<8x32xbf16> to vector<8x8xbf16>
    %86 = vector.shape_cast %85 : vector<8x8xbf16> to vector<1x8x8xbf16>
    %c0_54 = arith.constant 0 : index
    %c0_55 = arith.constant 0 : index
    %c0_56 = arith.constant 0 : index
    %c0_57 = arith.constant 0 : index
    %87 = vector.load %arg21[%c0_54, %c0_55, %c0_56, %c0_57] : memref<4x1x8x8xbf16, #tpu.memory_space<vmem>>, vector<1x1x8x8xbf16>
    %88 = vector.shape_cast %87 : vector<1x1x8x8xbf16> to vector<1x8x8xbf16>
    %89 = vector.shape_cast %86 : vector<1x8x8xbf16> to vector<1x1x8x8xbf16>
    tpu.vector_store %arg21[%c0_54, %c0_55, %c0_56, %c0_57], %89 {strides = array<i32>} : memref<4x1x8x8xbf16, #tpu.memory_space<vmem>>, vector<1x1x8x8xbf16>,
    %90 = vector.extract_strided_slice %84 {offsets = [0, 8], sizes = [8, 8], strides = [1, 1]} : vector<8x32xbf16> to vector<8x8xbf16>
    %91 = vector.shape_cast %90 : vector<8x8xbf16> to vector<1x8x8xbf16>
    %c1_58 = arith.constant 1 : index
    %c0_59 = arith.constant 0 : index
    %c0_60 = arith.constant 0 : index
    %c0_61 = arith.constant 0 : index
    %92 = vector.load %arg21[%c1_58, %c0_59, %c0_60, %c0_61] : memref<4x1x8x8xbf16, #tpu.memory_space<vmem>>, vector<1x1x8x8xbf16>
    %93 = vector.shape_cast %92 : vector<1x1x8x8xbf16> to vector<1x8x8xbf16>
    %94 = vector.shape_cast %91 : vector<1x8x8xbf16> to vector<1x1x8x8xbf16>
    tpu.vector_store %arg21[%c1_58, %c0_59, %c0_60, %c0_61], %94 {strides = array<i32>} : memref<4x1x8x8xbf16, #tpu.memory_space<vmem>>, vector<1x1x8x8xbf16>,
    %95 = vector.extract_strided_slice %84 {offsets = [0, 16], sizes = [8, 8], strides = [1, 1]} : vector<8x32xbf16> to vector<8x8xbf16>
    %96 = vector.shape_cast %95 : vector<8x8xbf16> to vector<1x8x8xbf16>
    %c2_62 = arith.constant 2 : index
    %c0_63 = arith.constant 0 : index
    %c0_64 = arith.constant 0 : index
    %c0_65 = arith.constant 0 : index
    %97 = vector.load %arg21[%c2_62, %c0_63, %c0_64, %c0_65] : memref<4x1x8x8xbf16, #tpu.memory_space<vmem>>, vector<1x1x8x8xbf16>
    %98 = vector.shape_cast %97 : vector<1x1x8x8xbf16> to vector<1x8x8xbf16>
    %99 = vector.shape_cast %96 : vector<1x8x8xbf16> to vector<1x1x8x8xbf16>
    tpu.vector_store %arg21[%c2_62, %c0_63, %c0_64, %c0_65], %99 {strides = array<i32>} : memref<4x1x8x8xbf16, #tpu.memory_space<vmem>>, vector<1x1x8x8xbf16>,
    %100 = vector.extract_strided_slice %84 {offsets = [0, 24], sizes = [8, 8], strides = [1, 1]} : vector<8x32xbf16> to vector<8x8xbf16>
    %101 = vector.shape_cast %100 : vector<8x8xbf16> to vector<1x8x8xbf16>
    %c3_66 = arith.constant 3 : index
    %c0_67 = arith.constant 0 : index
    %c0_68 = arith.constant 0 : index
    %c0_69 = arith.constant 0 : index
    %102 = vector.load %arg21[%c3_66, %c0_67, %c0_68, %c0_69] : memref<4x1x8x8xbf16, #tpu.memory_space<vmem>>, vector<1x1x8x8xbf16>
    %103 = vector.shape_cast %102 : vector<1x1x8x8xbf16> to vector<1x8x8xbf16>
    %104 = vector.shape_cast %101 : vector<1x8x8xbf16> to vector<1x1x8x8xbf16>
    tpu.vector_store %arg21[%c3_66, %c0_67, %c0_68, %c0_69], %104 {strides = array<i32>} : memref<4x1x8x8xbf16, #tpu.memory_space<vmem>>, vector<1x1x8x8xbf16>,
    %105 = tpu.iota {dimensions = array<i32: 0>} : vector<8x8xi32>
    %106 = tpu.iota {dimensions = array<i32: 1>} : vector<8x8xi32>
    %107 = arith.cmpi sge, %105, %106 : vector<8x8xi32>
    %c0_70 = arith.constant 0 : index
    %c0_71 = arith.constant 0 : index
    %108 = vector.load %arg11[%c0_70, %c0_71] : memref<1x32xf32, #tpu.memory_space<vmem>>, vector<1x32xf32>
    %109 = vector.broadcast %108 : vector<1x32xf32> to vector<8x32xf32>
    %110 = arith.addf %1, %109 : vector<8x32xf32>
    %c0_72 = arith.constant 0 : index
    %c0_73 = arith.constant 0 : index
    %111 = vector.load %arg22[%c0_72, %c0_73] : memref<8x32xf32, #tpu.memory_space<vmem>>, vector<8x32xf32>
    tpu.vector_store %arg22[%c0_72, %c0_73], %110 {strides = array<i32>} : memref<8x32xf32, #tpu.memory_space<vmem>>, vector<8x32xf32>,
    %c0_i32 = arith.constant 0 : i32
    %c4_i32 = arith.constant 4 : i32
    %112 = arith.addi %c0_i32, %c4_i32 : i32
    %c1_i32 = arith.constant 1 : i32
    scf.for %arg23 = %c0_i32 to %112 step %c1_i32  : i32 {
      %c1_i32_114 = arith.constant 1 : i32
      %173 = arith.muli %arg23, %c1_i32_114 : i32
      %c0_i32_115 = arith.constant 0 : i32
      %174 = arith.addi %c0_i32_115, %173 : i32
      %175 = arith.index_cast %174 : i32 to index
      %c0_116 = arith.constant 0 : index
      %c0_117 = arith.constant 0 : index
      %c0_118 = arith.constant 0 : index
      %176 = vector.load %arg19[%175, %c0_116, %c0_117, %c0_118] : memref<4x1x8x8xbf16, #tpu.memory_space<vmem>>, vector<1x1x8x8xbf16>
      %177 = vector.shape_cast %176 : vector<1x1x8x8xbf16> to vector<1x8x8xbf16>
      %178 = arith.index_cast %174 : i32 to index
      %c0_119 = arith.constant 0 : index
      %c0_120 = arith.constant 0 : index
      %c0_121 = arith.constant 0 : index
      %179 = vector.load %arg20[%178, %c0_119, %c0_120, %c0_121] : memref<4x1x8x8xbf16, #tpu.memory_space<vmem>>, vector<1x1x8x8xbf16>
      %180 = vector.shape_cast %179 : vector<1x1x8x8xbf16> to vector<1x8x8xbf16>
      %181 = arith.index_cast %174 : i32 to index
      %c0_122 = arith.constant 0 : index
      %c0_123 = arith.constant 0 : index
      %c0_124 = arith.constant 0 : index
      %182 = vector.load %arg21[%181, %c0_122, %c0_123, %c0_124] : memref<4x1x8x8xbf16, #tpu.memory_space<vmem>>, vector<1x1x8x8xbf16>
      %183 = vector.shape_cast %182 : vector<1x1x8x8xbf16> to vector<1x8x8xbf16>
      "tpu.trace_start"() <{level = 10 : i32, message = "bqd,bkd->bqk"}> : () -> ()
      %cst_125 = arith.constant dense<0.000000e+00> : vector<1x8x8xf32>
      %184 = tpu.matmul %177, %180, %cst_125 {dimension_numbers = #tpu.dot_dimension_numbers<[2], [2], [1], [1], [0, 0, 0, 1, 1, 1], [0], [0]>} : vector<1x8x8xbf16>, vector<1x8x8xbf16>, vector<1x8x8xf32> -> vector<1x8x8xf32>
      "tpu.trace_stop"() : () -> ()
      %185 = vector.shape_cast %107 : vector<8x8xi1> to vector<1x8x8xi1>
      %cst_126 = arith.constant -1.000000e+30 : f32
      %186 = vector.broadcast %cst_126 : f32 to vector<1x8x8xf32>
      %187 = arith.select %185, %184, %186 : vector<1x8x8xi1>, vector<1x8x8xf32>
      %cst_127 = arith.constant dense<0xFF800000> : vector<1x8xf32>
      %188 = vector.multi_reduction <maximumf>, %187, %cst_127 [2] : vector<1x8x8xf32> to vector<1x8xf32>
      %189 = vector.shape_cast %188 : vector<1x8xf32> to vector<1x8x1xf32>
      %190 = vector.broadcast %189 : vector<1x8x1xf32> to vector<1x8x8xf32>
      %191 = arith.subf %187, %190 : vector<1x8x8xf32>
      %192 = math.exp %191 : vector<1x8x8xf32>
      %cst_128 = arith.constant dense<0.000000e+00> : vector<1x8xf32>
      %193 = vector.multi_reduction <add>, %192, %cst_128 [2] : vector<1x8x8xf32> to vector<1x8xf32>
      %194 = vector.shape_cast %193 : vector<1x8xf32> to vector<1x8x1xf32>
      %195 = arith.truncf %192 : vector<1x8x8xf32> to vector<1x8x8xbf16>
      "tpu.trace_start"() <{level = 10 : i32, message = "bqk,bkd->bqd"}> : () -> ()
      %cst_129 = arith.constant dense<0.000000e+00> : vector<1x8x8xf32>
      %196 = tpu.matmul %195, %183, %cst_129 {dimension_numbers = #tpu.dot_dimension_numbers<[2], [1], [1], [2], [0, 0, 0, 1, 1, 2], [0], [0]>} : vector<1x8x8xbf16>, vector<1x8x8xbf16>, vector<1x8x8xf32> -> vector<1x8x8xf32>
      "tpu.trace_stop"() : () -> ()
      %197 = tpu.reciprocal %194 {approx = true} : vector<1x8x1xf32> -> vector<1x8x1xf32>
      %198 = vector.broadcast %197 : vector<1x8x1xf32> to vector<1x8x8xf32>
      %199 = arith.mulf %196, %198 : vector<1x8x8xf32>
      %200 = arith.truncf %199 : vector<1x8x8xf32> to vector<1x8x8xbf16>
      %201 = vector.shape_cast %200 : vector<1x8x8xbf16> to vector<8x8xbf16>
      %c0_130 = arith.constant 0 : index
      %c0_131 = arith.constant 0 : index
      %202 = vector.load %arg22[%c0_130, %c0_131] : memref<8x32xf32, #tpu.memory_space<vmem>>, vector<8x32xf32>
      %203 = arith.index_cast %174 : i32 to index
      %c0_132 = arith.constant 0 : index
      %c0_133 = arith.constant 0 : index
      %204 = vector.load %arg10[%203, %c0_132, %c0_133] : memref<4x8x32xbf16, #tpu.memory_space<vmem>>, vector<1x8x32xbf16>
      %205 = vector.shape_cast %204 : vector<1x8x32xbf16> to vector<8x32xbf16>
      %cst_134 = arith.constant dense<0.000000e+00> : vector<8x32xf32>
      %206 = tpu.matmul %201, %205, %cst_134 {dimension_numbers = #tpu.dot_dimension_numbers<[1], [0], [0], [1], [0, 0, 1, 1], [], []>} : vector<8x8xbf16>, vector<8x32xbf16>, vector<8x32xf32> -> vector<8x32xf32>
      %207 = arith.addf %202, %206 : vector<8x32xf32>
      %c0_135 = arith.constant 0 : index
      %c0_136 = arith.constant 0 : index
      %208 = vector.load %arg22[%c0_135, %c0_136] : memref<8x32xf32, #tpu.memory_space<vmem>>, vector<8x32xf32>
      tpu.vector_store %arg22[%c0_135, %c0_136], %207 {strides = array<i32>} : memref<8x32xf32, #tpu.memory_space<vmem>>, vector<8x32xf32>,
    }
    %c4_i32_74 = arith.constant 4 : i32
    %c0_75 = arith.constant 0 : index
    %c0_76 = arith.constant 0 : index
    %113 = vector.load %arg22[%c0_75, %c0_76] : memref<8x32xf32, #tpu.memory_space<vmem>>, vector<8x32xf32>
    %cst_77 = arith.constant dense<0.000000e+00> : vector<8xf32>
    %114 = vector.multi_reduction <add>, %113, %cst_77 [1] : vector<8x32xf32> to vector<8xf32>
    %115 = vector.shape_cast %114 : vector<8xf32> to vector<8x1xf32>
    %cst_78 = arith.constant 3.200000e+01 : f32
    %116 = vector.broadcast %cst_78 : f32 to vector<8x1xf32>
    %117 = arith.divf %115, %116 : vector<8x1xf32>
    %118 = vector.broadcast %117 : vector<8x1xf32> to vector<8x32xf32>
    %119 = arith.subf %113, %118 : vector<8x32xf32>
    %120 = arith.mulf %119, %119 : vector<8x32xf32>
    %cst_79 = arith.constant dense<0.000000e+00> : vector<8xf32>
    %121 = vector.multi_reduction <add>, %120, %cst_79 [1] : vector<8x32xf32> to vector<8xf32>
    %122 = vector.shape_cast %121 : vector<8xf32> to vector<8x1xf32>
    %cst_80 = arith.constant 3.200000e+01 : f32
    %123 = vector.broadcast %cst_80 : f32 to vector<8x1xf32>
    %124 = arith.divf %122, %123 : vector<8x1xf32>
    %125 = vector.broadcast %117 : vector<8x1xf32> to vector<8x32xf32>
    %126 = arith.subf %113, %125 : vector<8x32xf32>
    %cst_81 = arith.constant 9.99999974E-6 : f32
    %127 = vector.broadcast %cst_81 : f32 to vector<8x1xf32>
    %128 = arith.addf %124, %127 : vector<8x1xf32>
    %129 = math.rsqrt %128 : vector<8x1xf32>
    %130 = vector.broadcast %129 : vector<8x1xf32> to vector<8x32xf32>
    %131 = arith.mulf %126, %130 : vector<8x32xf32>
    %c0_82 = arith.constant 0 : index
    %c0_83 = arith.constant 0 : index
    %132 = vector.load %arg12[%c0_82, %c0_83] : memref<1x32xf32, #tpu.memory_space<vmem>>, vector<1x32xf32>
    %133 = vector.broadcast %132 : vector<1x32xf32> to vector<8x32xf32>
    %134 = arith.mulf %131, %133 : vector<8x32xf32>
    %c0_84 = arith.constant 0 : index
    %c0_85 = arith.constant 0 : index
    %135 = vector.load %arg13[%c0_84, %c0_85] : memref<1x32xf32, #tpu.memory_space<vmem>>, vector<1x32xf32>
    %136 = vector.broadcast %135 : vector<1x32xf32> to vector<8x32xf32>
    %137 = arith.addf %134, %136 : vector<8x32xf32>
    %138 = arith.truncf %137 : vector<8x32xf32> to vector<8x32xbf16>
    %c0_86 = arith.constant 0 : index
    %c0_87 = arith.constant 0 : index
    %139 = vector.load %arg17[%c0_86, %c0_87] : memref<1x32xf32, #tpu.memory_space<vmem>>, vector<1x32xf32>
    %140 = vector.broadcast %139 : vector<1x32xf32> to vector<8x32xf32>
    %141 = arith.addf %113, %140 : vector<8x32xf32>
    %c0_88 = arith.constant 0 : index
    %c0_89 = arith.constant 0 : index
    %142 = vector.load %arg22[%c0_88, %c0_89] : memref<8x32xf32, #tpu.memory_space<vmem>>, vector<8x32xf32>
    tpu.vector_store %arg22[%c0_88, %c0_89], %141 {strides = array<i32>} : memref<8x32xf32, #tpu.memory_space<vmem>>, vector<8x32xf32>,
    %c0_i32_90 = arith.constant 0 : i32
    %c1_i32_91 = arith.constant 1 : i32
    %143 = arith.muli %c0_i32_90, %c1_i32_91 : i32
    %c0_i32_92 = arith.constant 0 : i32
    %144 = arith.addi %c0_i32_92, %143 : i32
    %145 = arith.index_cast %144 : i32 to index
    %c0_93 = arith.constant 0 : index
    %c0_94 = arith.constant 0 : index
    %146 = vector.load %arg14[%145, %c0_93, %c0_94] : memref<1x32x128xbf16, #tpu.memory_space<vmem>>, vector<1x32x128xbf16>
    %147 = vector.shape_cast %146 : vector<1x32x128xbf16> to vector<32x128xbf16>
    %cst_95 = arith.constant dense<0.000000e+00> : vector<8x128xf32>
    %148 = tpu.matmul %138, %147, %cst_95 {dimension_numbers = #tpu.dot_dimension_numbers<[1], [0], [0], [1], [0, 0, 1, 1], [], []>} : vector<8x32xbf16>, vector<32x128xbf16>, vector<8x128xf32> -> vector<8x128xf32>
    %149 = arith.index_cast %144 : i32 to index
    %c0_96 = arith.constant 0 : index
    %c0_97 = arith.constant 0 : index
    %150 = vector.load %arg15[%149, %c0_96, %c0_97] : memref<1x1x128xf32, #tpu.memory_space<vmem>>, vector<1x1x128xf32>
    %151 = vector.shape_cast %150 : vector<1x1x128xf32> to vector<1x128xf32>
    %152 = vector.broadcast %151 : vector<1x128xf32> to vector<8x128xf32>
    %153 = arith.addf %148, %152 : vector<8x128xf32>
    %cst_98 = arith.constant 5.000000e-01 : f32
    %154 = vector.broadcast %cst_98 : f32 to vector<8x128xf32>
    %155 = arith.mulf %154, %153 : vector<8x128xf32>
    %cst_99 = arith.constant 0.707106769 : f32
    %156 = vector.broadcast %cst_99 : f32 to vector<8x128xf32>
    %157 = arith.mulf %153, %156 : vector<8x128xf32>
    %158 = math.erf %157 : vector<8x128xf32>
    %cst_100 = arith.constant 1.000000e+00 : f32
    %159 = vector.broadcast %cst_100 : f32 to vector<8x128xf32>
    %160 = arith.addf %159, %158 : vector<8x128xf32>
    %161 = arith.mulf %155, %160 : vector<8x128xf32>
    %c0_101 = arith.constant 0 : index
    %c0_102 = arith.constant 0 : index
    %162 = vector.load %arg22[%c0_101, %c0_102] : memref<8x32xf32, #tpu.memory_space<vmem>>, vector<8x32xf32>
    %163 = arith.truncf %161 : vector<8x128xf32> to vector<8x128xbf16>
    %164 = arith.index_cast %144 : i32 to index
    %c0_103 = arith.constant 0 : index
    %c0_104 = arith.constant 0 : index
    %165 = vector.load %arg16[%164, %c0_103, %c0_104] : memref<1x128x32xbf16, #tpu.memory_space<vmem>>, vector<1x128x32xbf16>
    %166 = vector.shape_cast %165 : vector<1x128x32xbf16> to vector<128x32xbf16>
    %cst_105 = arith.constant dense<0.000000e+00> : vector<8x32xf32>
    %167 = tpu.matmul %163, %166, %cst_105 {dimension_numbers = #tpu.dot_dimension_numbers<[1], [0], [0], [1], [0, 0, 1, 1], [], []>} : vector<8x128xbf16>, vector<128x32xbf16>, vector<8x32xf32> -> vector<8x32xf32>
    %168 = arith.addf %162, %167 : vector<8x32xf32>
    %c0_106 = arith.constant 0 : index
    %c0_107 = arith.constant 0 : index
    %169 = vector.load %arg22[%c0_106, %c0_107] : memref<8x32xf32, #tpu.memory_space<vmem>>, vector<8x32xf32>
    tpu.vector_store %arg22[%c0_106, %c0_107], %168 {strides = array<i32>} : memref<8x32xf32, #tpu.memory_space<vmem>>, vector<8x32xf32>,
    %c1_i32_108 = arith.constant 1 : i32
    %c0_109 = arith.constant 0 : index
    %c0_110 = arith.constant 0 : index
    %170 = vector.load %arg22[%c0_109, %c0_110] : memref<8x32xf32, #tpu.memory_space<vmem>>, vector<8x32xf32>
    %171 = vector.shape_cast %170 : vector<8x32xf32> to vector<1x8x32xf32>
    %c0_111 = arith.constant 0 : index
    %c0_112 = arith.constant 0 : index
    %c0_113 = arith.constant 0 : index
    %172 = vector.load %arg18[%c0_111, %c0_112, %c0_113] : memref<1x8x32xf32, #tpu.memory_space<vmem>>, vector<1x8x32xf32>
    tpu.vector_store %arg18[%c0_111, %c0_112, %c0_113], %171 {strides = array<i32>} : memref<1x8x32xf32, #tpu.memory_space<vmem>>, vector<1x8x32xf32>,
    return
  }
  func.func @transform_0(%arg0: i32) -> (i32, i32, i32) {
    %c0_i32 = arith.constant 0 : i32
    %c0_i32_0 = arith.constant 0 : i32
    %c0_i32_1 = arith.constant 0 : i32
    return %arg0, %c0_i32, %c0_i32_0 : i32, i32, i32
  }
  func.func @transform_1(%arg0: i32) -> (i32, i32) {
    %c0_i32 = arith.constant 0 : i32
    %c0_i32_0 = arith.constant 0 : i32
    %c0_i32_1 = arith.constant 0 : i32
    return %c0_i32, %c0_i32_0 : i32, i32
  }
  func.func @transform_2(%arg0: i32) -> (i32, i32) {
    %c0_i32 = arith.constant 0 : i32
    %c0_i32_0 = arith.constant 0 : i32
    %c0_i32_1 = arith.constant 0 : i32
    return %c0_i32, %c0_i32_0 : i32, i32
  }
  func.func @transform_3(%arg0: i32) -> (i32, i32) {
    %c0_i32 = arith.constant 0 : i32
    %c0_i32_0 = arith.constant 0 : i32
    %c0_i32_1 = arith.constant 0 : i32
    return %c0_i32, %c0_i32_0 : i32, i32
  }
  func.func @transform_4(%arg0: i32) -> (i32, i32) {
    %c0_i32 = arith.constant 0 : i32
    %c0_i32_0 = arith.constant 0 : i32
    %c0_i32_1 = arith.constant 0 : i32
    return %c0_i32, %c0_i32_0 : i32, i32
  }
  func.func @transform_5(%arg0: i32) -> (i32, i32) {
    %c0_i32 = arith.constant 0 : i32
    %c0_i32_0 = arith.constant 0 : i32
    %c0_i32_1 = arith.constant 0 : i32
    return %c0_i32, %c0_i32_0 : i32, i32
  }
  func.func @transform_6(%arg0: i32) -> (i32, i32) {
    %c0_i32 = arith.constant 0 : i32
    %c0_i32_0 = arith.constant 0 : i32
    %c0_i32_1 = arith.constant 0 : i32
    return %c0_i32, %c0_i32_0 : i32, i32
  }
  func.func @transform_7(%arg0: i32) -> (i32, i32) {
    %c0_i32 = arith.constant 0 : i32
    %c0_i32_0 = arith.constant 0 : i32
    %c0_i32_1 = arith.constant 0 : i32
    return %c0_i32, %c0_i32_0 : i32, i32
  }
  func.func @transform_8(%arg0: i32) -> (i32, i32) {
    %c0_i32 = arith.constant 0 : i32
    %c0_i32_0 = arith.constant 0 : i32
    %c0_i32_1 = arith.constant 0 : i32
    return %c0_i32, %c0_i32_0 : i32, i32
  }
  func.func @transform_9(%arg0: i32) -> (i32, i32, i32) {
    %c0_i32 = arith.constant 0 : i32
    %c0_i32_0 = arith.constant 0 : i32
    %c0_i32_1 = arith.constant 0 : i32
    %c0_i32_2 = arith.constant 0 : i32
    return %c0_i32, %c0_i32_0, %c0_i32_1 : i32, i32, i32
  }
  func.func @transform_10(%arg0: i32) -> (i32, i32) {
    %c0_i32 = arith.constant 0 : i32
    %c0_i32_0 = arith.constant 0 : i32
    %c0_i32_1 = arith.constant 0 : i32
    return %c0_i32, %c0_i32_0 : i32, i32
  }
  func.func @transform_11(%arg0: i32) -> (i32, i32) {
    %c0_i32 = arith.constant 0 : i32
    %c0_i32_0 = arith.constant 0 : i32
    %c0_i32_1 = arith.constant 0 : i32
    return %c0_i32, %c0_i32_0 : i32, i32
  }
  func.func @transform_12(%arg0: i32) -> (i32, i32) {
    %c0_i32 = arith.constant 0 : i32
    %c0_i32_0 = arith.constant 0 : i32
    %c0_i32_1 = arith.constant 0 : i32
    return %c0_i32, %c0_i32_0 : i32, i32
  }
  func.func @transform_13(%arg0: i32) -> (i32, i32, i32) {
    %c0_i32 = arith.constant 0 : i32
    %c0_i32_0 = arith.constant 0 : i32
    %c0_i32_1 = arith.constant 0 : i32
    %c0_i32_2 = arith.constant 0 : i32
    return %c0_i32, %c0_i32_0, %c0_i32_1 : i32, i32, i32
  }
  func.func @transform_14(%arg0: i32) -> (i32, i32, i32) {
    %c0_i32 = arith.constant 0 : i32
    %c0_i32_0 = arith.constant 0 : i32
    %c0_i32_1 = arith.constant 0 : i32
    %c0_i32_2 = arith.constant 0 : i32
    return %c0_i32, %c0_i32_0, %c0_i32_1 : i32, i32, i32
  }
  func.func @transform_15(%arg0: i32) -> (i32, i32, i32) {
    %c0_i32 = arith.constant 0 : i32
    %c0_i32_0 = arith.constant 0 : i32
    %c0_i32_1 = arith.constant 0 : i32
    %c0_i32_2 = arith.constant 0 : i32
    return %c0_i32, %c0_i32_0, %c0_i32_1 : i32, i32, i32
  }
  func.func @transform_16(%arg0: i32) -> (i32, i32) {
    %c0_i32 = arith.constant 0 : i32
    %c0_i32_0 = arith.constant 0 : i32
    %c0_i32_1 = arith.constant 0 : i32
    return %c0_i32, %c0_i32_0 : i32, i32
  }
  func.func @transform_17(%arg0: i32) -> (i32, i32, i32) {
    %c0_i32 = arith.constant 0 : i32
    %c0_i32_0 = arith.constant 0 : i32
    %c0_i32_1 = arith.constant 0 : i32
    return %arg0, %c0_i32, %c0_i32_0 : i32, i32, i32
  }
}

module attributes {stable_mosaic.version = 11 : i64} {
  func.func @kernel(%arg0: i32, %arg1: memref<1x8x32xf32, #tpu.memory_space<vmem>>, %arg2: memref<1x32xf32, #tpu.memory_space<vmem>>, %arg3: memref<1x32xf32, #tpu.memory_space<vmem>>, %arg4: memref<32x32xbf16, #tpu.memory_space<vmem>>, %arg5: memref<1x32xf32, #tpu.memory_space<vmem>>, %arg6: memref<32x32xbf16, #tpu.memory_space<vmem>>, %arg7: memref<1x32xf32, #tpu.memory_space<vmem>>, %arg8: memref<32x32xbf16, #tpu.memory_space<vmem>>, %arg9: memref<1x32xf32, #tpu.memory_space<vmem>>, %arg10: memref<4x8x32xbf16, #tpu.memory_space<vmem>>, %arg11: memref<1x32xf32, #tpu.memory_space<vmem>>, %arg12: memref<1x32xf32, #tpu.memory_space<vmem>>, %arg13: memref<1x32xf32, #tpu.memory_space<vmem>>, %arg14: memref<1x32x128xbf16, #tpu.memory_space<vmem>>, %arg15: memref<1x1x128xf32, #tpu.memory_space<vmem>>, %arg16: memref<1x128x32xbf16, #tpu.memory_space<vmem>>, %arg17: memref<1x32xf32, #tpu.memory_space<vmem>>, %arg18: memref<1x8x32xf32, #tpu.memory_space<vmem>>, %arg19: memref<4x1x8x8xbf16, #tpu.memory_space<vmem>>, %arg20: memref<4x1x8x8xbf16, #tpu.memory_space<vmem>>, %arg21: memref<4x1x8x8xbf16, #tpu.memory_space<vmem>>, %arg22: memref<8x32xf32, #tpu.memory_space<vmem>>) attributes {dimension_semantics = [#tpu.dimension_semantics<parallel>], iteration_bounds = array<i64: 2>, scalar_prefetch = 0 : i64, scratch_operands = 4 : i64, tpu.core_type = #tpu.core_type<tc>, window_params = [{transform_indices = @transform_0, window_bounds = array<i64: 1, 8, 32>}, {pipeline_mode = #tpu.pipeline_mode<synchronous>, transform_indices = @transform_1, window_bounds = array<i64: 1, 32>}, {pipeline_mode = #tpu.pipeline_mode<synchronous>, transform_indices = @transform_2, window_bounds = array<i64: 1, 32>}, {pipeline_mode = #tpu.pipeline_mode<synchronous>, transform_indices = @transform_3, window_bounds = array<i64: 32, 32>}, {pipeline_mode = #tpu.pipeline_mode<synchronous>, transform_indices = @transform_4, window_bounds = array<i64: 1, 32>}, {pipeline_mode = #tpu.pipeline_mode<synchronous>, transform_indices = @transform_5, window_bounds = array<i64: 32, 32>}, {pipeline_mode = #tpu.pipeline_mode<synchronous>, transform_indices = @transform_6, window_bounds = array<i64: 1, 32>}, {pipeline_mode = #tpu.pipeline_mode<synchronous>, transform_indices = @transform_7, window_bounds = array<i64: 32, 32>}, {pipeline_mode = #tpu.pipeline_mode<synchronous>, transform_indices = @transform_8, window_bounds = array<i64: 1, 32>}, {pipeline_mode = #tpu.pipeline_mode<synchronous>, transform_indices = @transform_9, window_bounds = array<i64: 4, 8, 32>}, {pipeline_mode = #tpu.pipeline_mode<synchronous>, transform_indices = @transform_10, window_bounds = array<i64: 1, 32>}, {pipeline_mode = #tpu.pipeline_mode<synchronous>, transform_indices = @transform_11, window_bounds = array<i64: 1, 32>}, {pipeline_mode = #tpu.pipeline_mode<synchronous>, transform_indices = @transform_12, window_bounds = array<i64: 1, 32>}, {pipeline_mode = #tpu.pipeline_mode<synchronous>, transform_indices = @transform_13, window_bounds = array<i64: 1, 32, 128>}, {pipeline_mode = #tpu.pipeline_mode<synchronous>, transform_indices = @transform_14, window_bounds = array<i64: 1, 1, 128>}, {pipeline_mode = #tpu.pipeline_mode<synchronous>, transform_indices = @transform_15, window_bounds = array<i64: 1, 128, 32>}, {pipeline_mode = #tpu.pipeline_mode<synchronous>, transform_indices = @transform_16, window_bounds = array<i64: 1, 32>}, {transform_indices = @transform_17, window_bounds = array<i64: 1, 8, 32>}]} {
    %c0 = arith.constant 0 : index
    %c0_0 = arith.constant 0 : index
    %c0_1 = arith.constant 0 : index
    %0 = vector.load %arg1[%c0, %c0_0, %c0_1] : memref<1x8x32xf32, #tpu.memory_space<vmem>>, vector<1x8x32xf32>
    %1 = vector.shape_cast %0 : vector<1x8x32xf32> to vector<8x32xf32>
    %cst = arith.constant dense<0.000000e+00> : vector<8xf32>
    %2 = vector.multi_reduction <add>, %1, %cst [1] : vector<8x32xf32> to vector<8xf32>
    %3 = vector.shape_cast %2 : vector<8xf32> to vector<8x1xf32>
    %cst_2 = arith.constant 3.200000e+01 : f32
    %4 = vector.broadcast %cst_2 : f32 to vector<8x1xf32>
    %5 = arith.divf %3, %4 : vector<8x1xf32>
    %6 = vector.broadcast %5 : vector<8x1xf32> to vector<8x32xf32>
    %7 = arith.subf %1, %6 : vector<8x32xf32>
    %8 = arith.mulf %7, %7 : vector<8x32xf32>
    %cst_3 = arith.constant dense<0.000000e+00> : vector<8xf32>
    %9 = vector.multi_reduction <add>, %8, %cst_3 [1] : vector<8x32xf32> to vector<8xf32>
    %10 = vector.shape_cast %9 : vector<8xf32> to vector<8x1xf32>
    %cst_4 = arith.constant 3.200000e+01 : f32
    %11 = vector.broadcast %cst_4 : f32 to vector<8x1xf32>
    %12 = arith.divf %10, %11 : vector<8x1xf32>
    %13 = vector.broadcast %5 : vector<8x1xf32> to vector<8x32xf32>
    %14 = arith.subf %1, %13 : vector<8x32xf32>
    %cst_5 = arith.constant 9.99999974E-6 : f32
    %15 = vector.broadcast %cst_5 : f32 to vector<8x1xf32>
    %16 = arith.addf %12, %15 : vector<8x1xf32>
    %17 = math.rsqrt %16 : vector<8x1xf32>
    %18 = vector.broadcast %17 : vector<8x1xf32> to vector<8x32xf32>
    %19 = arith.mulf %14, %18 : vector<8x32xf32>
    %c0_6 = arith.constant 0 : index
    %c0_7 = arith.constant 0 : index
    %20 = vector.load %arg2[%c0_6, %c0_7] : memref<1x32xf32, #tpu.memory_space<vmem>>, vector<1x32xf32>
    %21 = vector.broadcast %20 : vector<1x32xf32> to vector<8x32xf32>
    %22 = arith.mulf %19, %21 : vector<8x32xf32>
    %c0_8 = arith.constant 0 : index
    %c0_9 = arith.constant 0 : index
    %23 = vector.load %arg3[%c0_8, %c0_9] : memref<1x32xf32, #tpu.memory_space<vmem>>, vector<1x32xf32>
    %24 = vector.broadcast %23 : vector<1x32xf32> to vector<8x32xf32>
    %25 = arith.addf %22, %24 : vector<8x32xf32>
    %26 = arith.truncf %25 : vector<8x32xf32> to vector<8x32xbf16>
    %c0_10 = arith.constant 0 : index
    %c0_11 = arith.constant 0 : index
    %27 = vector.load %arg4[%c0_10, %c0_11] : memref<32x32xbf16, #tpu.memory_space<vmem>>, vector<32x32xbf16>
    %cst_12 = arith.constant dense<0.000000e+00> : vector<8x32xf32>
    %28 = tpu.matmul %26, %27, %cst_12 {dimension_numbers = #tpu.dot_dimension_numbers<[1], [0], [0], [1], [0, 0, 1, 1], [], []>} : vector<8x32xbf16>, vector<32x32xbf16>, vector<8x32xf32> -> vector<8x32xf32>
    %c0_13 = arith.constant 0 : index
    %c0_14 = arith.constant 0 : index
    %29 = vector.load %arg5[%c0_13, %c0_14] : memref<1x32xf32, #tpu.memory_space<vmem>>, vector<1x32xf32>
    %30 = vector.broadcast %29 : vector<1x32xf32> to vector<8x32xf32>
    %31 = arith.addf %28, %30 : vector<8x32xf32>
    %32 = arith.truncf %31 : vector<8x32xf32> to vector<8x32xbf16>
    %33 = vector.extract_strided_slice %32 {offsets = [0, 0], sizes = [8, 8], strides = [1, 1]} : vector<8x32xbf16> to vector<8x8xbf16>
    %34 = vector.shape_cast %33 : vector<8x8xbf16> to vector<1x8x8xbf16>
    %c0_15 = arith.constant 0 : index
    %c0_16 = arith.constant 0 : index
    %c0_17 = arith.constant 0 : index
    %c0_18 = arith.constant 0 : index
    %35 = vector.load %arg19[%c0_15, %c0_16, %c0_17, %c0_18] : memref<4x1x8x8xbf16, #tpu.memory_space<vmem>>, vector<1x1x8x8xbf16>
    %36 = vector.shape_cast %35 : vector<1x1x8x8xbf16> to vector<1x8x8xbf16>
    %37 = vector.shape_cast %34 : vector<1x8x8xbf16> to vector<1x1x8x8xbf16>
    tpu.vector_store %arg19[%c0_15, %c0_16, %c0_17, %c0_18], %37 {strides = array<i32>} : memref<4x1x8x8xbf16, #tpu.memory_space<vmem>>, vector<1x1x8x8xbf16>,
    %38 = vector.extract_strided_slice %32 {offsets = [0, 8], sizes = [8, 8], strides = [1, 1]} : vector<8x32xbf16> to vector<8x8xbf16>
    %39 = vector.shape_cast %38 : vector<8x8xbf16> to vector<1x8x8xbf16>
    %c1 = arith.constant 1 : index
    %c0_19 = arith.constant 0 : index
    %c0_20 = arith.constant 0 : index
    %c0_21 = arith.constant 0 : index
    %40 = vector.load %arg19[%c1, %c0_19, %c0_20, %c0_21] : memref<4x1x8x8xbf16, #tpu.memory_space<vmem>>, vector<1x1x8x8xbf16>
    %41 = vector.shape_cast %40 : vector<1x1x8x8xbf16> to vector<1x8x8xbf16>
    %42 = vector.shape_cast %39 : vector<1x8x8xbf16> to vector<1x1x8x8xbf16>
    tpu.vector_store %arg19[%c1, %c0_19, %c0_20, %c0_21], %42 {strides = array<i32>} : memref<4x1x8x8xbf16, #tpu.memory_space<vmem>>, vector<1x1x8x8xbf16>,
    %43 = vector.extract_strided_slice %32 {offsets = [0, 16], sizes = [8, 8], strides = [1, 1]} : vector<8x32xbf16> to vector<8x8xbf16>
    %44 = vector.shape_cast %43 : vector<8x8xbf16> to vector<1x8x8xbf16>
    %c2 = arith.constant 2 : index
    %c0_22 = arith.constant 0 : index
    %c0_23 = arith.constant 0 : index
    %c0_24 = arith.constant 0 : index
    %45 = vector.load %arg19[%c2, %c0_22, %c0_23, %c0_24] : memref<4x1x8x8xbf16, #tpu.memory_space<vmem>>, vector<1x1x8x8xbf16>
    %46 = vector.shape_cast %45 : vector<1x1x8x8xbf16> to vector<1x8x8xbf16>
    %47 = vector.shape_cast %44 : vector<1x8x8xbf16> to vector<1x1x8x8xbf16>
    tpu.vector_store %arg19[%c2, %c0_22, %c0_23, %c0_24], %47 {strides = array<i32>} : memref<4x1x8x8xbf16, #tpu.memory_space<vmem>>, vector<1x1x8x8xbf16>,
    %48 = vector.extract_strided_slice %32 {offsets = [0, 24], sizes = [8, 8], strides = [1, 1]} : vector<8x32xbf16> to vector<8x8xbf16>
    %49 = vector.shape_cast %48 : vector<8x8xbf16> to vector<1x8x8xbf16>
    %c3 = arith.constant 3 : index
    %c0_25 = arith.constant 0 : index
    %c0_26 = arith.constant 0 : index
    %c0_27 = arith.constant 0 : index
    %50 = vector.load %arg19[%c3, %c0_25, %c0_26, %c0_27] : memref<4x1x8x8xbf16, #tpu.memory_space<vmem>>, vector<1x1x8x8xbf16>
    %51 = vector.shape_cast %50 : vector<1x1x8x8xbf16> to vector<1x8x8xbf16>
    %52 = vector.shape_cast %49 : vector<1x8x8xbf16> to vector<1x1x8x8xbf16>
    tpu.vector_store %arg19[%c3, %c0_25, %c0_26, %c0_27], %52 {strides = array<i32>} : memref<4x1x8x8xbf16, #tpu.memory_space<vmem>>, vector<1x1x8x8xbf16>,
    %c0_28 = arith.constant 0 : index
    %c0_29 = arith.constant 0 : index
    %53 = vector.load %arg6[%c0_28, %c0_29] : memref<32x32xbf16, #tpu.memory_space<vmem>>, vector<32x32xbf16>
    %cst_30 = arith.constant dense<0.000000e+00> : vector<8x32xf32>
    %54 = tpu.matmul %26, %53, %cst_30 {dimension_numbers = #tpu.dot_dimension_numbers<[1], [0], [0], [1], [0, 0, 1, 1], [], []>} : vector<8x32xbf16>, vector<32x32xbf16>, vector<8x32xf32> -> vector<8x32xf32>
    %c0_31 = arith.constant 0 : index
    %c0_32 = arith.constant 0 : index
    %55 = vector.load %arg7[%c0_31, %c0_32] : memref<1x32xf32, #tpu.memory_space<vmem>>, vector<1x32xf32>
    %56 = vector.broadcast %55 : vector<1x32xf32> to vector<8x32xf32>
    %57 = arith.addf %54, %56 : vector<8x32xf32>
    %58 = arith.truncf %57 : vector<8x32xf32> to vector<8x32xbf16>
    %59 = vector.extract_strided_slice %58 {offsets = [0, 0], sizes = [8, 8], strides = [1, 1]} : vector<8x32xbf16> to vector<8x8xbf16>
    %60 = vector.shape_cast %59 : vector<8x8xbf16> to vector<1x8x8xbf16>
    %c0_33 = arith.constant 0 : index
    %c0_34 = arith.constant 0 : index
    %c0_35 = arith.constant 0 : index
    %c0_36 = arith.constant 0 : index
    %61 = vector.load %arg20[%c0_33, %c0_34, %c0_35, %c0_36] : memref<4x1x8x8xbf16, #tpu.memory_space<vmem>>, vector<1x1x8x8xbf16>
    %62 = vector.shape_cast %61 : vector<1x1x8x8xbf16> to vector<1x8x8xbf16>
    %63 = vector.shape_cast %60 : vector<1x8x8xbf16> to vector<1x1x8x8xbf16>
    tpu.vector_store %arg20[%c0_33, %c0_34, %c0_35, %c0_36], %63 {strides = array<i32>} : memref<4x1x8x8xbf16, #tpu.memory_space<vmem>>, vector<1x1x8x8xbf16>,
    %64 = vector.extract_strided_slice %58 {offsets = [0, 8], sizes = [8, 8], strides = [1, 1]} : vector<8x32xbf16> to vector<8x8xbf16>
    %65 = vector.shape_cast %64 : vector<8x8xbf16> to vector<1x8x8xbf16>
    %c1_37 = arith.constant 1 : index
    %c0_38 = arith.constant 0 : index
    %c0_39 = arith.constant 0 : index
    %c0_40 = arith.constant 0 : index
    %66 = vector.load %arg20[%c1_37, %c0_38, %c0_39, %c0_40] : memref<4x1x8x8xbf16, #tpu.memory_space<vmem>>, vector<1x1x8x8xbf16>
    %67 = vector.shape_cast %66 : vector<1x1x8x8xbf16> to vector<1x8x8xbf16>
    %68 = vector.shape_cast %65 : vector<1x8x8xbf16> to vector<1x1x8x8xbf16>
    tpu.vector_store %arg20[%c1_37, %c0_38, %c0_39, %c0_40], %68 {strides = array<i32>} : memref<4x1x8x8xbf16, #tpu.memory_space<vmem>>, vector<1x1x8x8xbf16>,
    %69 = vector.extract_strided_slice %58 {offsets = [0, 16], sizes = [8, 8], strides = [1, 1]} : vector<8x32xbf16> to vector<8x8xbf16>
    %70 = vector.shape_cast %69 : vector<8x8xbf16> to vector<1x8x8xbf16>
    %c2_41 = arith.constant 2 : index
    %c0_42 = arith.constant 0 : index
    %c0_43 = arith.constant 0 : index
    %c0_44 = arith.constant 0 : index
    %71 = vector.load %arg20[%c2_41, %c0_42, %c0_43, %c0_44] : memref<4x1x8x8xbf16, #tpu.memory_space<vmem>>, vector<1x1x8x8xbf16>
    %72 = vector.shape_cast %71 : vector<1x1x8x8xbf16> to vector<1x8x8xbf16>
    %73 = vector.shape_cast %70 : vector<1x8x8xbf16> to vector<1x1x8x8xbf16>
    tpu.vector_store %arg20[%c2_41, %c0_42, %c0_43, %c0_44], %73 {strides = array<i32>} : memref<4x1x8x8xbf16, #tpu.memory_space<vmem>>, vector<1x1x8x8xbf16>,
    %74 = vector.extract_strided_slice %58 {offsets = [0, 24], sizes = [8, 8], strides = [1, 1]} : vector<8x32xbf16> to vector<8x8xbf16>
    %75 = vector.shape_cast %74 : vector<8x8xbf16> to vector<1x8x8xbf16>
    %c3_45 = arith.constant 3 : index
    %c0_46 = arith.constant 0 : index
    %c0_47 = arith.constant 0 : index
    %c0_48 = arith.constant 0 : index
    %76 = vector.load %arg20[%c3_45, %c0_46, %c0_47, %c0_48] : memref<4x1x8x8xbf16, #tpu.memory_space<vmem>>, vector<1x1x8x8xbf16>
    %77 = vector.shape_cast %76 : vector<1x1x8x8xbf16> to vector<1x8x8xbf16>
    %78 = vector.shape_cast %75 : vector<1x8x8xbf16> to vector<1x1x8x8xbf16>
    tpu.vector_store %arg20[%c3_45, %c0_46, %c0_47, %c0_48], %78 {strides = array<i32>} : memref<4x1x8x8xbf16, #tpu.memory_space<vmem>>, vector<1x1x8x8xbf16>,
    %c0_49 = arith.constant 0 : index
    %c0_50 = arith.constant 0 : index
    %79 = vector.load %arg8[%c0_49, %c0_50] : memref<32x32xbf16, #tpu.memory_space<vmem>>, vector<32x32xbf16>
    %cst_51 = arith.constant dense<0.000000e+00> : vector<8x32xf32>
    %80 = tpu.matmul %26, %79, %cst_51 {dimension_numbers = #tpu.dot_dimension_numbers<[1], [0], [0], [1], [0, 0, 1, 1], [], []>} : vector<8x32xbf16>, vector<32x32xbf16>, vector<8x32xf32> -> vector<8x32xf32>
    %c0_52 = arith.constant 0 : index
    %c0_53 = arith.constant 0 : index
    %81 = vector.load %arg9[%c0_52, %c0_53] : memref<1x32xf32, #tpu.memory_space<vmem>>, vector<1x32xf32>
    %82 = vector.broadcast %81 : vector<1x32xf32> to vector<8x32xf32>
    %83 = arith.addf %80, %82 : vector<8x32xf32>
    %84 = arith.truncf %83 : vector<8x32xf32> to vector<8x32xbf16>
    %85 = vector.extract_strided_slice %84 {offsets = [0, 0], sizes = [8, 8], strides = [1, 1]} : vector<8x32xbf16> to vector<8x8xbf16>
    %86 = vector.shape_cast %85 : vector<8x8xbf16> to vector<1x8x8xbf16>
    %c0_54 = arith.constant 0 : index
    %c0_55 = arith.constant 0 : index
    %c0_56 = arith.constant 0 : index
    %c0_57 = arith.constant 0 : index
    %87 = vector.load %arg21[%c0_54, %c0_55, %c0_56, %c0_57] : memref<4x1x8x8xbf16, #tpu.memory_space<vmem>>, vector<1x1x8x8xbf16>
    %88 = vector.shape_cast %87 : vector<1x1x8x8xbf16> to vector<1x8x8xbf16>
    %89 = vector.shape_cast %86 : vector<1x8x8xbf16> to vector<1x1x8x8xbf16>
    tpu.vector_store %arg21[%c0_54, %c0_55, %c0_56, %c0_57], %89 {strides = array<i32>} : memref<4x1x8x8xbf16, #tpu.memory_space<vmem>>, vector<1x1x8x8xbf16>,
    %90 = vector.extract_strided_slice %84 {offsets = [0, 8], sizes = [8, 8], strides = [1, 1]} : vector<8x32xbf16> to vector<8x8xbf16>
    %91 = vector.shape_cast %90 : vector<8x8xbf16> to vector<1x8x8xbf16>
    %c1_58 = arith.constant 1 : index
    %c0_59 = arith.constant 0 : index
    %c0_60 = arith.constant 0 : index
    %c0_61 = arith.constant 0 : index
    %92 = vector.load %arg21[%c1_58, %c0_59, %c0_60, %c0_61] : memref<4x1x8x8xbf16, #tpu.memory_space<vmem>>, vector<1x1x8x8xbf16>
    %93 = vector.shape_cast %92 : vector<1x1x8x8xbf16> to vector<1x8x8xbf16>
    %94 = vector.shape_cast %91 : vector<1x8x8xbf16> to vector<1x1x8x8xbf16>
    tpu.vector_store %arg21[%c1_58, %c0_59, %c0_60, %c0_61], %94 {strides = array<i32>} : memref<4x1x8x8xbf16, #tpu.memory_space<vmem>>, vector<1x1x8x8xbf16>,
    %95 = vector.extract_strided_slice %84 {offsets = [0, 16], sizes = [8, 8], strides = [1, 1]} : vector<8x32xbf16> to vector<8x8xbf16>
    %96 = vector.shape_cast %95 : vector<8x8xbf16> to vector<1x8x8xbf16>
    %c2_62 = arith.constant 2 : index
    %c0_63 = arith.constant 0 : index
    %c0_64 = arith.constant 0 : index
    %c0_65 = arith.constant 0 : index
    %97 = vector.load %arg21[%c2_62, %c0_63, %c0_64, %c0_65] : memref<4x1x8x8xbf16, #tpu.memory_space<vmem>>, vector<1x1x8x8xbf16>
    %98 = vector.shape_cast %97 : vector<1x1x8x8xbf16> to vector<1x8x8xbf16>
    %99 = vector.shape_cast %96 : vector<1x8x8xbf16> to vector<1x1x8x8xbf16>
    tpu.vector_store %arg21[%c2_62, %c0_63, %c0_64, %c0_65], %99 {strides = array<i32>} : memref<4x1x8x8xbf16, #tpu.memory_space<vmem>>, vector<1x1x8x8xbf16>,
    %100 = vector.extract_strided_slice %84 {offsets = [0, 24], sizes = [8, 8], strides = [1, 1]} : vector<8x32xbf16> to vector<8x8xbf16>
    %101 = vector.shape_cast %100 : vector<8x8xbf16> to vector<1x8x8xbf16>
    %c3_66 = arith.constant 3 : index
    %c0_67 = arith.constant 0 : index
    %c0_68 = arith.constant 0 : index
    %c0_69 = arith.constant 0 : index
    %102 = vector.load %arg21[%c3_66, %c0_67, %c0_68, %c0_69] : memref<4x1x8x8xbf16, #tpu.memory_space<vmem>>, vector<1x1x8x8xbf16>
    %103 = vector.shape_cast %102 : vector<1x1x8x8xbf16> to vector<1x8x8xbf16>
    %104 = vector.shape_cast %101 : vector<1x8x8xbf16> to vector<1x1x8x8xbf16>
    tpu.vector_store %arg21[%c3_66, %c0_67, %c0_68, %c0_69], %104 {strides = array<i32>} : memref<4x1x8x8xbf16, #tpu.memory_space<vmem>>, vector<1x1x8x8xbf16>,
    %105 = tpu.iota {dimensions = array<i32: 0>} : vector<8x8xi32>
    %106 = tpu.iota {dimensions = array<i32: 1>} : vector<8x8xi32>
    %107 = arith.cmpi sge, %105, %106 : vector<8x8xi32>
    %c0_70 = arith.constant 0 : index
    %c0_71 = arith.constant 0 : index
    %108 = vector.load %arg11[%c0_70, %c0_71] : memref<1x32xf32, #tpu.memory_space<vmem>>, vector<1x32xf32>
    %109 = vector.broadcast %108 : vector<1x32xf32> to vector<8x32xf32>
    %110 = arith.addf %1, %109 : vector<8x32xf32>
    %c0_72 = arith.constant 0 : index
    %c0_73 = arith.constant 0 : index
    %111 = vector.load %arg22[%c0_72, %c0_73] : memref<8x32xf32, #tpu.memory_space<vmem>>, vector<8x32xf32>
    tpu.vector_store %arg22[%c0_72, %c0_73], %110 {strides = array<i32>} : memref<8x32xf32, #tpu.memory_space<vmem>>, vector<8x32xf32>,
    %c0_i32 = arith.constant 0 : i32
    %c4_i32 = arith.constant 4 : i32
    %112 = arith.addi %c0_i32, %c4_i32 : i32
    %c1_i32 = arith.constant 1 : i32
    scf.for %arg23 = %c0_i32 to %112 step %c1_i32  : i32 {
      %c1_i32_114 = arith.constant 1 : i32
      %173 = arith.muli %arg23, %c1_i32_114 : i32
      %c0_i32_115 = arith.constant 0 : i32
      %174 = arith.addi %c0_i32_115, %173 : i32
      %175 = arith.index_cast %174 : i32 to index
      %c0_116 = arith.constant 0 : index
      %c0_117 = arith.constant 0 : index
      %c0_118 = arith.constant 0 : index
      %176 = vector.load %arg19[%175, %c0_116, %c0_117, %c0_118] : memref<4x1x8x8xbf16, #tpu.memory_space<vmem>>, vector<1x1x8x8xbf16>
      %177 = vector.shape_cast %176 : vector<1x1x8x8xbf16> to vector<1x8x8xbf16>
      %178 = arith.index_cast %174 : i32 to index
      %c0_119 = arith.constant 0 : index
      %c0_120 = arith.constant 0 : index
      %c0_121 = arith.constant 0 : index
      %179 = vector.load %arg20[%178, %c0_119, %c0_120, %c0_121] : memref<4x1x8x8xbf16, #tpu.memory_space<vmem>>, vector<1x1x8x8xbf16>
      %180 = vector.shape_cast %179 : vector<1x1x8x8xbf16> to vector<1x8x8xbf16>
      %181 = arith.index_cast %174 : i32 to index
      %c0_122 = arith.constant 0 : index
      %c0_123 = arith.constant 0 : index
      %c0_124 = arith.constant 0 : index
      %182 = vector.load %arg21[%181, %c0_122, %c0_123, %c0_124] : memref<4x1x8x8xbf16, #tpu.memory_space<vmem>>, vector<1x1x8x8xbf16>
      %183 = vector.shape_cast %182 : vector<1x1x8x8xbf16> to vector<1x8x8xbf16>
      "tpu.trace_start"() <{level = 10 : i32, message = "bqd,bkd->bqk"}> : () -> ()
      %cst_125 = arith.constant dense<0.000000e+00> : vector<1x8x8xf32>
      %184 = tpu.matmul %177, %180, %cst_125 {dimension_numbers = #tpu.dot_dimension_numbers<[2], [2], [1], [1], [0, 0, 0, 1, 1, 1], [0], [0]>} : vector<1x8x8xbf16>, vector<1x8x8xbf16>, vector<1x8x8xf32> -> vector<1x8x8xf32>
      "tpu.trace_stop"() : () -> ()
      %185 = vector.shape_cast %107 : vector<8x8xi1> to vector<1x8x8xi1>
      %cst_126 = arith.constant -1.000000e+30 : f32
      %186 = vector.broadcast %cst_126 : f32 to vector<1x8x8xf32>
      %187 = arith.select %185, %184, %186 : vector<1x8x8xi1>, vector<1x8x8xf32>
      %cst_127 = arith.constant dense<0xFF800000> : vector<1x8xf32>
      %188 = vector.multi_reduction <maximumf>, %187, %cst_127 [2] : vector<1x8x8xf32> to vector<1x8xf32>
      %189 = vector.shape_cast %188 : vector<1x8xf32> to vector<1x8x1xf32>
      %190 = vector.broadcast %189 : vector<1x8x1xf32> to vector<1x8x8xf32>
      %191 = arith.subf %187, %190 : vector<1x8x8xf32>
      %192 = math.exp %191 : vector<1x8x8xf32>
      %cst_128 = arith.constant dense<0.000000e+00> : vector<1x8xf32>
      %193 = vector.multi_reduction <add>, %192, %cst_128 [2] : vector<1x8x8xf32> to vector<1x8xf32>
      %194 = vector.shape_cast %193 : vector<1x8xf32> to vector<1x8x1xf32>
      %195 = arith.truncf %192 : vector<1x8x8xf32> to vector<1x8x8xbf16>
      "tpu.trace_start"() <{level = 10 : i32, message = "bqk,bkd->bqd"}> : () -> ()
      %cst_129 = arith.constant dense<0.000000e+00> : vector<1x8x8xf32>
      %196 = tpu.matmul %195, %183, %cst_129 {dimension_numbers = #tpu.dot_dimension_numbers<[2], [1], [1], [2], [0, 0, 0, 1, 1, 2], [0], [0]>} : vector<1x8x8xbf16>, vector<1x8x8xbf16>, vector<1x8x8xf32> -> vector<1x8x8xf32>
      "tpu.trace_stop"() : () -> ()
      %197 = tpu.reciprocal %194 {approx = true} : vector<1x8x1xf32> -> vector<1x8x1xf32>
      %198 = vector.broadcast %197 : vector<1x8x1xf32> to vector<1x8x8xf32>
      %199 = arith.mulf %196, %198 : vector<1x8x8xf32>
      %200 = arith.truncf %199 : vector<1x8x8xf32> to vector<1x8x8xbf16>
      %201 = vector.shape_cast %200 : vector<1x8x8xbf16> to vector<8x8xbf16>
      %c0_130 = arith.constant 0 : index
      %c0_131 = arith.constant 0 : index
      %202 = vector.load %arg22[%c0_130, %c0_131] : memref<8x32xf32, #tpu.memory_space<vmem>>, vector<8x32xf32>
      %203 = arith.index_cast %174 : i32 to index
      %c0_132 = arith.constant 0 : index
      %c0_133 = arith.constant 0 : index
      %204 = vector.load %arg10[%203, %c0_132, %c0_133] : memref<4x8x32xbf16, #tpu.memory_space<vmem>>, vector<1x8x32xbf16>
      %205 = vector.shape_cast %204 : vector<1x8x32xbf16> to vector<8x32xbf16>
      %cst_134 = arith.constant dense<0.000000e+00> : vector<8x32xf32>
      %206 = tpu.matmul %201, %205, %cst_134 {dimension_numbers = #tpu.dot_dimension_numbers<[1], [0], [0], [1], [0, 0, 1, 1], [], []>} : vector<8x8xbf16>, vector<8x32xbf16>, vector<8x32xf32> -> vector<8x32xf32>
      %207 = arith.addf %202, %206 : vector<8x32xf32>
      %c0_135 = arith.constant 0 : index
      %c0_136 = arith.constant 0 : index
      %208 = vector.load %arg22[%c0_135, %c0_136] : memref<8x32xf32, #tpu.memory_space<vmem>>, vector<8x32xf32>
      tpu.vector_store %arg22[%c0_135, %c0_136], %207 {strides = array<i32>} : memref<8x32xf32, #tpu.memory_space<vmem>>, vector<8x32xf32>,
    }
    %c4_i32_74 = arith.constant 4 : i32
    %c0_75 = arith.constant 0 : index
    %c0_76 = arith.constant 0 : index
    %113 = vector.load %arg22[%c0_75, %c0_76] : memref<8x32xf32, #tpu.memory_space<vmem>>, vector<8x32xf32>
    %cst_77 = arith.constant dense<0.000000e+00> : vector<8xf32>
    %114 = vector.multi_reduction <add>, %113, %cst_77 [1] : vector<8x32xf32> to vector<8xf32>
    %115 = vector.shape_cast %114 : vector<8xf32> to vector<8x1xf32>
    %cst_78 = arith.constant 3.200000e+01 : f32
    %116 = vector.broadcast %cst_78 : f32 to vector<8x1xf32>
    %117 = arith.divf %115, %116 : vector<8x1xf32>
    %118 = vector.broadcast %117 : vector<8x1xf32> to vector<8x32xf32>
    %119 = arith.subf %113, %118 : vector<8x32xf32>
    %120 = arith.mulf %119, %119 : vector<8x32xf32>
    %cst_79 = arith.constant dense<0.000000e+00> : vector<8xf32>
    %121 = vector.multi_reduction <add>, %120, %cst_79 [1] : vector<8x32xf32> to vector<8xf32>
    %122 = vector.shape_cast %121 : vector<8xf32> to vector<8x1xf32>
    %cst_80 = arith.constant 3.200000e+01 : f32
    %123 = vector.broadcast %cst_80 : f32 to vector<8x1xf32>
    %124 = arith.divf %122, %123 : vector<8x1xf32>
    %125 = vector.broadcast %117 : vector<8x1xf32> to vector<8x32xf32>
    %126 = arith.subf %113, %125 : vector<8x32xf32>
    %cst_81 = arith.constant 9.99999974E-6 : f32
    %127 = vector.broadcast %cst_81 : f32 to vector<8x1xf32>
    %128 = arith.addf %124, %127 : vector<8x1xf32>
    %129 = math.rsqrt %128 : vector<8x1xf32>
    %130 = vector.broadcast %129 : vector<8x1xf32> to vector<8x32xf32>
    %131 = arith.mulf %126, %130 : vector<8x32xf32>
    %c0_82 = arith.constant 0 : index
    %c0_83 = arith.constant 0 : index
    %132 = vector.load %arg12[%c0_82, %c0_83] : memref<1x32xf32, #tpu.memory_space<vmem>>, vector<1x32xf32>
    %133 = vector.broadcast %132 : vector<1x32xf32> to vector<8x32xf32>
    %134 = arith.mulf %131, %133 : vector<8x32xf32>
    %c0_84 = arith.constant 0 : index
    %c0_85 = arith.constant 0 : index
    %135 = vector.load %arg13[%c0_84, %c0_85] : memref<1x32xf32, #tpu.memory_space<vmem>>, vector<1x32xf32>
    %136 = vector.broadcast %135 : vector<1x32xf32> to vector<8x32xf32>
    %137 = arith.addf %134, %136 : vector<8x32xf32>
    %138 = arith.truncf %137 : vector<8x32xf32> to vector<8x32xbf16>
    %c0_86 = arith.constant 0 : index
    %c0_87 = arith.constant 0 : index
    %139 = vector.load %arg17[%c0_86, %c0_87] : memref<1x32xf32, #tpu.memory_space<vmem>>, vector<1x32xf32>
    %140 = vector.broadcast %139 : vector<1x32xf32> to vector<8x32xf32>
    %141 = arith.addf %113, %140 : vector<8x32xf32>
    %c0_88 = arith.constant 0 : index
    %c0_89 = arith.constant 0 : index
    %142 = vector.load %arg22[%c0_88, %c0_89] : memref<8x32xf32, #tpu.memory_space<vmem>>, vector<8x32xf32>
    tpu.vector_store %arg22[%c0_88, %c0_89], %141 {strides = array<i32>} : memref<8x32xf32, #tpu.memory_space<vmem>>, vector<8x32xf32>,
    %c0_i32_90 = arith.constant 0 : i32
    %c1_i32_91 = arith.constant 1 : i32
    %143 = arith.muli %c0_i32_90, %c1_i32_91 : i32
    %c0_i32_92 = arith.constant 0 : i32
    %144 = arith.addi %c0_i32_92, %143 : i32
    %145 = arith.index_cast %144 : i32 to index
    %c0_93 = arith.constant 0 : index
    %c0_94 = arith.constant 0 : index
    %146 = vector.load %arg14[%145, %c0_93, %c0_94] : memref<1x32x128xbf16, #tpu.memory_space<vmem>>, vector<1x32x128xbf16>
    %147 = vector.shape_cast %146 : vector<1x32x128xbf16> to vector<32x128xbf16>
    %cst_95 = arith.constant dense<0.000000e+00> : vector<8x128xf32>
    %148 = tpu.matmul %138, %147, %cst_95 {dimension_numbers = #tpu.dot_dimension_numbers<[1], [0], [0], [1], [0, 0, 1, 1], [], []>} : vector<8x32xbf16>, vector<32x128xbf16>, vector<8x128xf32> -> vector<8x128xf32>
    %149 = arith.index_cast %144 : i32 to index
    %c0_96 = arith.constant 0 : index
    %c0_97 = arith.constant 0 : index
    %150 = vector.load %arg15[%149, %c0_96, %c0_97] : memref<1x1x128xf32, #tpu.memory_space<vmem>>, vector<1x1x128xf32>
    %151 = vector.shape_cast %150 : vector<1x1x128xf32> to vector<1x128xf32>
    %152 = vector.broadcast %151 : vector<1x128xf32> to vector<8x128xf32>
    %153 = arith.addf %148, %152 : vector<8x128xf32>
    %cst_98 = arith.constant 5.000000e-01 : f32
    %154 = vector.broadcast %cst_98 : f32 to vector<8x128xf32>
    %155 = arith.mulf %154, %153 : vector<8x128xf32>
    %cst_99 = arith.constant 0.707106769 : f32
    %156 = vector.broadcast %cst_99 : f32 to vector<8x128xf32>
    %157 = arith.mulf %153, %156 : vector<8x128xf32>
    %158 = math.erf %157 : vector<8x128xf32>
    %cst_100 = arith.constant 1.000000e+00 : f32
    %159 = vector.broadcast %cst_100 : f32 to vector<8x128xf32>
    %160 = arith.addf %159, %158 : vector<8x128xf32>
    %161 = arith.mulf %155, %160 : vector<8x128xf32>
    %c0_101 = arith.constant 0 : index
    %c0_102 = arith.constant 0 : index
    %162 = vector.load %arg22[%c0_101, %c0_102] : memref<8x32xf32, #tpu.memory_space<vmem>>, vector<8x32xf32>
    %163 = arith.truncf %161 : vector<8x128xf32> to vector<8x128xbf16>
    %164 = arith.index_cast %144 : i32 to index
    %c0_103 = arith.constant 0 : index
    %c0_104 = arith.constant 0 : index
    %165 = vector.load %arg16[%164, %c0_103, %c0_104] : memref<1x128x32xbf16, #tpu.memory_space<vmem>>, vector<1x128x32xbf16>
    %166 = vector.shape_cast %165 : vector<1x128x32xbf16> to vector<128x32xbf16>
    %cst_105 = arith.constant dense<0.000000e+00> : vector<8x32xf32>
    %167 = tpu.matmul %163, %166, %cst_105 {dimension_numbers = #tpu.dot_dimension_numbers<[1], [0], [0], [1], [0, 0, 1, 1], [], []>} : vector<8x128xbf16>, vector<128x32xbf16>, vector<8x32xf32> -> vector<8x32xf32>
    %168 = arith.addf %162, %167 : vector<8x32xf32>
    %c0_106 = arith.constant 0 : index
    %c0_107 = arith.constant 0 : index
    %169 = vector.load %arg22[%c0_106, %c0_107] : memref<8x32xf32, #tpu.memory_space<vmem>>, vector<8x32xf32>
    tpu.vector_store %arg22[%c0_106, %c0_107], %168 {strides = array<i32>} : memref<8x32xf32, #tpu.memory_space<vmem>>, vector<8x32xf32>,
    %c1_i32_108 = arith.constant 1 : i32
    %c0_109 = arith.constant 0 : index
    %c0_110 = arith.constant 0 : index
    %170 = vector.load %arg22[%c0_109, %c0_110] : memref<8x32xf32, #tpu.memory_space<vmem>>, vector<8x32xf32>
    %171 = vector.shape_cast %170 : vector<8x32xf32> to vector<1x8x32xf32>
    %c0_111 = arith.constant 0 : index
    %c0_112 = arith.constant 0 : index
    %c0_113 = arith.constant 0 : index
    %172 = vector.load %arg18[%c0_111, %c0_112, %c0_113] : memref<1x8x32xf32, #tpu.memory_space<vmem>>, vector<1x8x32xf32>
    tpu.vector_store %arg18[%c0_111, %c0_112, %c0_113], %171 {strides = array<i32>} : memref<1x8x32xf32, #tpu.memory_space<vmem>>, vector<1x8x32xf32>,
    return
  }
  func.func @transform_0(%arg0: i32) -> (i32, i32, i32) {
    %c0_i32 = arith.constant 0 : i32
    %c0_i32_0 = arith.constant 0 : i32
    %c0_i32_1 = arith.constant 0 : i32
    return %arg0, %c0_i32, %c0_i32_0 : i32, i32, i32
  }
  func.func @transform_1(%arg0: i32) -> (i32, i32) {
    %c0_i32 = arith.constant 0 : i32
    %c0_i32_0 = arith.constant 0 : i32
    %c0_i32_1 = arith.constant 0 : i32
    return %c0_i32, %c0_i32_0 : i32, i32
  }
  func.func @transform_2(%arg0: i32) -> (i32, i32) {
    %c0_i32 = arith.constant 0 : i32
    %c0_i32_0 = arith.constant 0 : i32
    %c0_i32_1 = arith.constant 0 : i32
    return %c0_i32, %c0_i32_0 : i32, i32
  }
  func.func @transform_3(%arg0: i32) -> (i32, i32) {
    %c0_i32 = arith.constant 0 : i32
    %c0_i32_0 = arith.constant 0 : i32
    %c0_i32_1 = arith.constant 0 : i32
    return %c0_i32, %c0_i32_0 : i32, i32
  }
  func.func @transform_4(%arg0: i32) -> (i32, i32) {
    %c0_i32 = arith.constant 0 : i32
    %c0_i32_0 = arith.constant 0 : i32
    %c0_i32_1 = arith.constant 0 : i32
    return %c0_i32, %c0_i32_0 : i32, i32
  }
  func.func @transform_5(%arg0: i32) -> (i32, i32) {
    %c0_i32 = arith.constant 0 : i32
    %c0_i32_0 = arith.constant 0 : i32
    %c0_i32_1 = arith.constant 0 : i32
    return %c0_i32, %c0_i32_0 : i32, i32
  }
  func.func @transform_6(%arg0: i32) -> (i32, i32) {
    %c0_i32 = arith.constant 0 : i32
    %c0_i32_0 = arith.constant 0 : i32
    %c0_i32_1 = arith.constant 0 : i32
    return %c0_i32, %c0_i32_0 : i32, i32
  }
  func.func @transform_7(%arg0: i32) -> (i32, i32) {
    %c0_i32 = arith.constant 0 : i32
    %c0_i32_0 = arith.constant 0 : i32
    %c0_i32_1 = arith.constant 0 : i32
    return %c0_i32, %c0_i32_0 : i32, i32
  }
  func.func @transform_8(%arg0: i32) -> (i32, i32) {
    %c0_i32 = arith.constant 0 : i32
    %c0_i32_0 = arith.constant 0 : i32
    %c0_i32_1 = arith.constant 0 : i32
    return %c0_i32, %c0_i32_0 : i32, i32
  }
  func.func @transform_9(%arg0: i32) -> (i32, i32, i32) {
    %c0_i32 = arith.constant 0 : i32
    %c0_i32_0 = arith.constant 0 : i32
    %c0_i32_1 = arith.constant 0 : i32
    %c0_i32_2 = arith.constant 0 : i32
    return %c0_i32, %c0_i32_0, %c0_i32_1 : i32, i32, i32
  }
  func.func @transform_10(%arg0: i32) -> (i32, i32) {
    %c0_i32 = arith.constant 0 : i32
    %c0_i32_0 = arith.constant 0 : i32
    %c0_i32_1 = arith.constant 0 : i32
    return %c0_i32, %c0_i32_0 : i32, i32
  }
  func.func @transform_11(%arg0: i32) -> (i32, i32) {
    %c0_i32 = arith.constant 0 : i32
    %c0_i32_0 = arith.constant 0 : i32
    %c0_i32_1 = arith.constant 0 : i32
    return %c0_i32, %c0_i32_0 : i32, i32
  }
  func.func @transform_12(%arg0: i32) -> (i32, i32) {
    %c0_i32 = arith.constant 0 : i32
    %c0_i32_0 = arith.constant 0 : i32
    %c0_i32_1 = arith.constant 0 : i32
    return %c0_i32, %c0_i32_0 : i32, i32
  }
  func.func @transform_13(%arg0: i32) -> (i32, i32, i32) {
    %c0_i32 = arith.constant 0 : i32
    %c0_i32_0 = arith.constant 0 : i32
    %c0_i32_1 = arith.constant 0 : i32
    %c0_i32_2 = arith.constant 0 : i32
    return %c0_i32, %c0_i32_0, %c0_i32_1 : i32, i32, i32
  }
  func.func @transform_14(%arg0: i32) -> (i32, i32, i32) {
    %c0_i32 = arith.constant 0 : i32
    %c0_i32_0 = arith.constant 0 : i32
    %c0_i32_1 = arith.constant 0 : i32
    %c0_i32_2 = arith.constant 0 : i32
    return %c0_i32, %c0_i32_0, %c0_i32_1 : i32, i32, i32
  }
  func.func @transform_15(%arg0: i32) -> (i32, i32, i32) {
    %c0_i32 = arith.constant 0 : i32
    %c0_i32_0 = arith.constant 0 : i32
    %c0_i32_1 = arith.constant 0 : i32
    %c0_i32_2 = arith.constant 0 : i32
    return %c0_i32, %c0_i32_0, %c0_i32_1 : i32, i32, i32
  }
  func.func @transform_16(%arg0: i32) -> (i32, i32) {
    %c0_i32 = arith.constant 0 : i32
    %c0_i32_0 = arith.constant 0 : i32
    %c0_i32_1 = arith.constant 0 : i32
    return %c0_i32, %c0_i32_0 : i32, i32
  }
  func.func @transform_17(%arg0: i32) -> (i32, i32, i32) {
    %c0_i32 = arith.constant 0 : i32
    %c0_i32_0 = arith.constant 0 : i32
    %c0_i32_1 = arith.constant 0 : i32
    return %arg0, %c0_i32, %c0_i32_0 : i32, i32, i32
  }
}

</mosaic_0001>

<bundles_post_ra>
// kernel: tpu_custom_call.1
= control target key start
LH: loop header
LB: loop body
LE: loop exit
PB: predicated region body
PF: predicated region fallthrough
CT: control target
= control target key end

     0   :  { %s1888_s0 = inlined_call_operand.vmem [shape: f32[2,8,32], index: 0, kind: input, shape index: {}]   ;;  %s1889_s1 = inlined_call_operand.hbm [shape: f32[1,32], index: 1, kind: input, shape index: {}]   ;;  %s1890_s2 = inlined_call_operand.vmem [shape: f32[1,32], index: 2, kind: input, shape index: {}]   ;;  %s1891_s3 = inlined_call_operand.vmem [shape: bf16[32,32], index: 3, kind: input, shape index: {}]   ;;  %s1892_s4 = inlined_call_operand.vmem [shape: f32[1,32], index: 4, kind: input, shape index: {}]   ;;  %s1893_s5 = inlined_call_operand.vmem [shape: bf16[32,32], index: 5, kind: input, shape index: {}]   ;;  %s1894_s6 = inlined_call_operand.vmem [shape: f32[1,32], index: 6, kind: input, shape index: {}]   ;;  %s1895_s7 = inlined_call_operand.vmem [shape: bf16[32,32], index: 7, kind: input, shape index: {}]   ;;  %s1896_s8 = inlined_call_operand.vmem [shape: f32[1,32], index: 8, kind: input, shape index: {}]   ;;  %s1897_s9 = inlined_call_operand.vmem [shape: bf16[4,8,32], index: 9, kind: input, shape index: {}]   ;;  %s1898_s10 = inlined_call_operand.vmem [shape: f32[1,32], index: 10, kind: input, shape index: {}]   ;;  %s1899_s11 = inlined_call_operand.vmem [shape: f32[1,32], index: 11, kind: input, shape index: {}]   ;;  %s1900_s12 = inlined_call_operand.vmem [shape: f32[1,32], index: 12, kind: input, shape index: {}]   ;;  %s1901_s13 = inlined_call_operand.hbm [shape: bf16[1,32,128], index: 13, kind: input, shape index: {}]   ;;  %s1902_s14 = inlined_call_operand.vmem [shape: f32[1,1,128], index: 14, kind: input, shape index: {}]   ;;  %s1903_s15 = inlined_call_operand.vmem [shape: bf16[1,128,32], index: 15, kind: input, shape index: {}]   ;;  %s1904_s16 = inlined_call_operand.vmem [shape: f32[1,32], index: 16, kind: input, shape index: {}]   ;;  %s1905_s17 = inlined_call_operand.hbm [shape: f32[2,8,32], index: 17, kind: output, shape index: {}]  }
   0x1   :  { %1912 = sst [smem:[#allocation21_spill]] %s1888_s0 }
   0x2   :  { %1913 = sst [smem:[#allocation22_spill]] %s1889_s1 }
   0x3   :  { %1914 = sst [smem:[#allocation23_spill]] %s1890_s2 }
   0x4   :  { %22 = vsyncpa [#allocation7], 0 }
   0x5   :  { %23 = vsyncpa [#allocation10], 0 }
   0x6   :  { %24 = vsyncpa [#allocation8], 0 }
   0x7   :  { %26 = vsyncpa [#allocation8 + $0x1], 0  ;;  %s1634_s24 = smov 0   ;;  %s1636_s25 = smov 0  }
   0x8   :  { %s1638_s26 = smov 0   ;;  %s1640_s27 = smov 0  }
   0x9 LB: > { %1915 = sst [smem:[#allocation15_spill]] %s1518_s24  ;;  %s1655_s28 = sadd.s32 4294967295, %s1530_s27   ;;  %s1530_s27 = sphi %s1640_s27, %s1930_s27   ;;  %s1526_s26 = sphi %s1638_s26, %s1932_s26   ;;  %s1522_s25 = sphi %s1636_s25, %s1934_s25   ;;  %s1518_s24 = sphi %s1634_s24, %s1933_s24  }
   0xa   : > { %1916 = sst [smem:[#allocation16_spill]] %s1526_s26  ;;  %s1194_s29 = sadd.s32 4294967294, %s1530_s27  }
   0xb   : > { %1917 = sst [smem:[#allocation17_spill]] %s1530_s27  ;;  %s1659_s0 = sadd.s32 1, %s1530_s27  }
   0xc   : > { %1918 = sst [smem:[#allocation18_spill]] %s1659_s0  ;;  %s401_s30 = sadd.s32 1, %s1526_s26 }
   0xd   : > { %s398_s18 = ssub.s32 %s1530_s27, %s1659_s0  ;;  %p411_p0 = scmp.ne.s32.totalorder %s1526_s26, %s1522_s25 }
   0xe   : > { %p399_p1 = scmp.eq.s32.totalorder %s398_s18, 0  ;;  %p412_p2 = scmp.eq.s32.totalorder %s1655_s28, 1 }
   0xf   : > { %p417_p3 = scmp.ne.s32.totalorder %s1522_s25, %s1518_s24  ;;  %p418_p4 = scmp.eq.s32.totalorder %s1194_s29, 1 }
  0x10   : > { %s1670_s19 = scalar_select %p399_p1, %s1526_s26, %s401_s30  }
  0x11   : > { %p1672_p5 = por %p412_p2, %p411_p0  ;;  %p1676_p6 = por %p418_p4, %p417_p3 }
  0x12   : > { %1919 = sst [smem:[#allocation19_spill]] %s1670_s19  ;;  %p1195_p7 = scmp.ge.s32.totalorder %s1530_s27, 1 }
  0x13   : > { %s1921_s20 = scalar_select %p1676_p6, 1, 0 }
  0x14   : > { %p425_p8 = scmp.lt.s32.totalorder %s1530_s27, 3  ;;  %p1321_p9 = scmp.eq.s32.totalorder %s1655_s28, 0 }
  0x15   : > { %1922 = sst [smem:[#allocation20_spill]] %s1921_s20  ;;  %s1536_s18 = smov [#allocation6]  }
  0x16   : > { %p1683_p10 = pnand %p1195_p7, %p425_p8  ;;  %s1924_s29 = sld [smem:[#allocation22_spill]] }
  0x17   : > { %s439_s19 = sshll.u32 %s1536_s18, 4  ;;  %s481_s20 = sshll.u32 %s1901_s13, 4  ;;  %s440_s19 = int_to_ptr.vmem [resolvable:$true] %s439_s19  ;;  %s482_s20 = int_to_ptr.hbm [resolvable:$true] %s481_s20 }
  0x18   : > { %p1310_p11 = pneg %p1683_p10  ;;  %s1537_s24 = smov [#allocation9]  }
  0x19   : > { %s483_s27 = sshll.u32 %s1537_s24, 4  ;;  %s1538_s22 = smov 64   ;;  %s484_s27 = int_to_ptr.vmem [resolvable:$true] %s483_s27 }
  0x1a   : > { %p1311_p12 = pnand %p1321_p9, %p1310_p11  ;;  %s1539_s23 = smov 4  }
  0x1b   : > { %515 = sbr.rel (%p1683_p10) target bundleno = 1714 (0x6b2), region = 88 }
  0x1c   : > { %s437_s30 = sshll.u32 %s1924_s29, 4  ;;  %s438_s30 = int_to_ptr.hbm [resolvable:$true] %s437_s30 }
  0x1d   : > { %1313 = dma.hbm_to_vmem [thread:$0]  (!%p1311_p12), %s438_s30, 16, %s440_s19, [#allocation7]  }
  0x1e   : > { %1316 = dma.hbm_to_vmem [thread:$0]  (!%p1311_p12), %s482_s20, 256, %s484_s27, [#allocation10], %s1538_s22, %s1538_s22, %s1539_s23  }
  0x20   : > { %1505 = dma.done.wait (%p1321_p9), [#allocation7], 16  }
  0x21   : > { %1507 = vsyncadd (%p1321_p9), [#allocation7], 4294967280 }
  0x22   : > { %1509 = dma.done.wait (%p1321_p9), [#allocation10], 256  }
  0x23   : > { %1511 = vsyncadd (%p1321_p9), [#allocation10], 4294967040  ;;  %p572_p13 = scmp.lt.s32.totalorder %s1655_s28, 1  ;;  %s1925_s19 = sld [smem:[#allocation21_spill]]  ;;  %vm578_vm0 = vcmask 261120   ;;  %v1540_v4 = vmov 32.0   ;;  %v776_v55 = vlaneseq }
  0x24   : > { %v1374_v1 = vld [vmem:[%s1898_s10] ss:$0 sm:$0xff]  ;;  %1380 = vrcp.f32 %v1540_v4  ;;  %s569_s30 = sand.u32 1, %s1522_s25   ;;  %v1285_v16 = vld [vmem:[%s1891_s3 + $0x8] sm:$0xff]  ;;  %v1375_v31 = vld [vmem:[#allocation6] ss:$0 sm:$0xff] }
  0x25   : > { %s573_s24 = scalar_select %p572_p13, %s1655_s28, 1  ;;  %v1287_v17 = vld [vmem:[%s1893_s5 + $0x8] sm:$0xff]  ;;  %648 = vmatpush.bf16.msra.mxu0 %v1285_v16  ;;  %v1284_v19 = vld [vmem:[%s1891_s3] sm:$0xff]  ;;  %vm656_vm5 = vcmask 60416   ;;  %v1766_v57 = vshrl.u32 %v776_v55, 7  ;;  %v1768_v58 = vand.u32 127, %v776_v55 }
  0x26   : > { %s1724_s18 = sshll.u32 %s569_s30, 3  ;;  %v1289_v18 = vld [vmem:[%s1895_s7 + $0x8] sm:$0xff]  ;;  %700 = vmatpush.bf16.msra.mxu1 %v1287_v17  ;;  %v1286_v20 = vld [vmem:[%s1893_s5] sm:$0xff]  ;;  %s1926_s2 = sld [smem:[#allocation23_spill]] }
  0x27   : > { %s1203_s26 = sshll.u32 %s573_s24, 3  ;;  %751 = vmatpush.bf16.msra.mxu2 %v1289_v18  ;;  %v1288_v21 = vld [vmem:[%s1895_s7] sm:$0xff]  ;;  %s1541_s22 = smov 112   ;;  %vm780_vm6 = vcmp.ge.s32.totalorder %v1766_v57, %v1768_v58 }
  0x28   : > { %v1377_v38 = vld [vmem:[%s1892_s4] ss:$0 sm:$0xff]  ;;  %s1542_s23 = smov 104   ;;  %s1543_s24 = smov 120  }
  0x29   : > { %s575_s20 = scalar_lea.vmem %s1925_s19, %s1203_s26  ;;  %649 = vmatpush.bf16.msra.mxu0 %v1284_v19  ;;  %v1378_v39 = vld [vmem:[%s1894_s6] ss:$0 sm:$0xff]  ;;  %s571_s26 = scalar_lea.vmem [#allocation11], %s1724_s18 }
  0x2a   : > { %v577_v0 = vld [vmem:[%s575_s20] sm:$0xff]  ;;  %v1381_v5 = vpop.eup %1380  ;;  %701 = vmatpush.bf16.msra.mxu1 %v1286_v20  ;;  %s1779_s27 = smov 0  }
  0x2b   : > { %v579_v2 = vsel %vm578_vm0, %v577_v0, 0.0  ;;  %v785_v3 = vadd.f32 %v1374_v1, %v577_v0  ;;  %v583_v6 = vmul.f32 32.0, %v1381_v5  ;;  %vm587_vm1 = vweird.f32 %v1381_v5  ;;  %752 = vmatpush.bf16.msra.mxu2 %v1288_v21  ;;  %v1379_v46 = vld [vmem:[%s1896_s8] ss:$0 sm:$0xff] }
  0x2c   : > { %580 = vadd.xlane.f32.xlu0 %v579_v2  ;;  %v1376_v34 = vld [vmem:[%s1926_s2] ss:$0 sm:$0xff] }
  0x2d   : > { %786 = vst.msk [vmem:[#allocation5] sm:$0xff] %vm578_vm0, %v785_v3  ;;  %v584_v7 = vsub.f32 1.0, %v583_v6 }
  0x2f   : > { %v585_v8 = vmul.f32 %v1381_v5, %v584_v7 }
  0x31   : > { %v586_v9 = vadd.f32 %v1381_v5, %v585_v8 }
  0x33   : > { %v1717_v10 = vsel %vm587_vm1, %v1381_v5, %v586_v9 }
  0x9f   : > { %v581_v11 = vpop.xlane.xlu0 %580 }
  0xa0   : > { %v589_v12 = vmul.f32 %v1717_v10, %v581_v11 }
  0xa2   : > { %v590_v13 = vsub.f32 %v577_v0, %v589_v12 }
  0xa4   : > { %v591_v14 = vmul.f32 %v590_v13, %v590_v13 }
  0xa6   : > { %v592_v15 = vsel %vm578_vm0, %v591_v14, 0.0 }
  0xa7   : > { %593 = vadd.xlane.f32.xlu0 %v592_v15 }
 0x11a   : > { %v594_v22 = vpop.xlane.xlu0 %593 }
 0x11b   : > { %v595_v23 = vmul.f32 %v594_v22, %v1717_v10 }
 0x11d   : > { %v596_v24 = vadd.f32 1e-05, %v595_v23 }
 0x11f   : > { %1382 = vrsqrt.f32 %v596_v24  ;;  %vm603_vm3 = vweird.f32 %v596_v24 }
 0x125   : > { %v1383_v25 = vpop.eup %1382 }
 0x126   : > { %v598_v26 = vmul.f32 %v1383_v25, %v596_v24  ;;  %vm604_vm2 = vweird.f32 %v1383_v25 }
 0x127   : > { %vm605_vm4 = vmor %vm603_vm3, %vm604_vm2 }
 0x128   : > { %v599_v27 = vmul.f32 %v1383_v25, %v598_v26 }
 0x12a   : > { %v600_v28 = vmul.f32 0.5, %v599_v27 }
 0x12c   : > { %v601_v29 = vsub.f32 1.5, %v600_v28 }
 0x12e   : > { %v602_v30 = vmul.f32 %v1383_v25, %v601_v29 }
 0x130   : > { %v606_v32 = vsel %vm605_vm4, %v1383_v25, %v602_v30 }
 0x131   : > { %v607_v33 = vmul.f32 %v606_v32, %v590_v13 }
 0x133   : > { %v612_v35 = vmul.f32 %v1375_v31, %v607_v33 }
 0x135   : > { %v617_v36 = vadd.f32 %v1376_v34, %v612_v35 }
 0x137   : > { %v618_v37 = vpack.c.bf16 %v617_v36, %v617_v36 }
 0x139   : > { %1212 = vmatmul.msk.bf16.vlgmr.msra.gmra.mxu0 %vm578_vm0, %v618_v37  ;;  %1221 = vmatmul.msk.bf16.vlgmr.msra.gmra.mxu1 %vm578_vm0, %v618_v37 }
 0x13a   : > { %1230 = vmatmul.msk.bf16.vlgmr.msra.gmra.mxu2 %vm578_vm0, %v618_v37 }
 0x1b6   : > { %v651_v40 = vpop.f32.mrf.mxu0  ;;  %v703_v41 = vpop.f32.mrf.mxu1 }
 0x1b7   : > { %v652_v42 = vadd.f32 %v1377_v38, %v651_v40  ;;  %v704_v43 = vadd.f32 %v1378_v39, %v703_v41 }
 0x1b9   : > { %v655_v44 = vpack.c.bf16 %v652_v42, %v652_v42  ;;  %v707_v45 = vpack.c.bf16 %v704_v43, %v704_v43 }
 0x1bb   : > { %657 = vst.msk [vmem:[#allocation2] sm:$0xf] %vm656_vm5, %v655_v44  ;;  %715 = vrot.lane.b32.xlu0 %v707_v45, %s1541_s22  ;;  %669 = vrot.lane.b32.xlu2 %v655_v44, %s1542_s23 }
 0x1bc   : > { %708 = vst.msk [vmem:[#allocation3] sm:$0xf] %vm656_vm5, %v707_v45  ;;  %659 = vrot.lane.b32.xlu1 %v655_v44, %s1543_s24 }
 0x1bd   : > { %v754_v47 = vpop.f32.mrf.mxu2 }
 0x1be   : > { %v755_v48 = vadd.f32 %v1379_v46, %v754_v47  ;;  %v653_v49 = vpop.f32.mrf.mxu0  ;;  %v705_v50 = vpop.f32.mrf.mxu1 }
 0x1c0   : > { %v758_v51 = vpack.c.bf16 %v755_v48, %v755_v48 }
 0x1c2   : > { %759 = vst.msk [vmem:[#allocation4] sm:$0xf] %vm656_vm5, %v758_v51 }
 0x1c3   : > { %710 = vrot.lane.b32.xlu2 %v707_v45, %s1543_s24 }
 0x1c4   : > { %664 = vrot.lane.b32.xlu1 %v655_v44, %s1541_s22 }
 0x1c5   : > { %v756_v52 = vpop.f32.mrf.mxu2 }
 0x1cb   : > { %761 = vrot.lane.b32.xlu2 %v758_v51, %s1543_s24 }
 0x1cc   : > { %720 = vrot.lane.b32.xlu1 %v707_v45, %s1542_s23 }
 0x1d3   : > { %771 = vrot.lane.b32.xlu2 %v758_v51, %s1542_s23 }
 0x1d4   : > { %766 = vrot.lane.b32.xlu1 %v758_v51, %s1541_s22 }
 0x215   : > { %v670_v53 = vpop.permute.xlu2 %669 }
 0x216   : > { %673 = vst.msk [vmem:[#allocation2 + $0xc] sm:$0xf] %vm656_vm5, %v670_v53 }
 0x21d   : > { %v711_v54 = vpop.permute.xlu2 %710 }
 0x21e   : > { %714 = vst.msk [vmem:[#allocation3 + $0x4] sm:$0xf] %vm656_vm5, %v711_v54 }
 0x225   : > { %v762_v56 = vpop.permute.xlu2 %761 }
 0x226   : > { %765 = vst.msk [vmem:[#allocation4 + $0x4] sm:$0xf] %vm656_vm5, %v762_v56 }
 0x22d   : > { %v716_v59 = vpop.permute.xlu0 %715  ;;  %v772_v60 = vpop.permute.xlu2 %771 }
 0x22e   : > { %719 = vst.msk [vmem:[#allocation3 + $0x8] sm:$0xf] %vm656_vm5, %v716_v59  ;;  %v660_v61 = vpop.permute.xlu1 %659 }
 0x22f   : > { %775 = vst.msk [vmem:[#allocation4 + $0xc] sm:$0xf] %vm656_vm5, %v772_v60 }
 0x230   : > { %663 = vst.msk [vmem:[#allocation2 + $0x4] sm:$0xf] %vm656_vm5, %v660_v61 }
 0x236   : > { %v665_v62 = vpop.permute.xlu1 %664 }
 0x237   : > { %668 = vst.msk [vmem:[#allocation2 + $0x8] sm:$0xf] %vm656_vm5, %v665_v62 }
 0x23e   : > { %v721_v63 = vpop.permute.xlu1 %720 }
 0x23f   : > { %724 = vst.msk [vmem:[#allocation3 + $0xc] sm:$0xf] %vm656_vm5, %v721_v63 }
 0x246   : > { %v767_v0 = vpop.permute.xlu1 %766 }
 0x247   : > { %770 = vst.msk [vmem:[#allocation4 + $0x8] sm:$0xf] %vm656_vm5, %v767_v0 }
 0x248 LB: >> { %s1785_s0 = sshll.u32 %s1534_s27, 2  ;;  %vm802_vm7 = vcmask 64512   ;;  %vm836_vm8 = vcmask 1043456   ;;  %v856_v25 = vld [vmem:[#allocation5] sm:$0xff]  ;;  %s792_s27 = sadd.s32 1, %s1534_s27   ;;  %s1534_s27 = sphi %s1779_s27, %s792_s27  }
 0x249   : >> { %s797_s19 = scalar_lea.vmem [#allocation3], %s1785_s0  ;;  %s794_s20 = scalar_lea.vmem [#allocation2], %s1785_s0 }
 0x24a   : >> { %v798_v1 = vld [vmem:[%s797_s19] sm:$0xf]  ;;  %s800_s21 = scalar_lea.vmem [#allocation4], %s1785_s0  ;;  %s858_s23 = scalar_lea.vmem %s1897_s9, %s1785_s0 }
 0x24b   : >> { %v807_v2 = vsel %vm802_vm7, %v798_v1, 0  ;;  %v795_v3 = vld [vmem:[%s794_s20] sm:$0xf]  ;;  %p789_p0 = scmp.ge.s32.totalorder %s792_s27, 4  }
 0x24c   : >> { %816 = vmatpush.bf16.xpose.msra.mxu0 %v807_v2  ;;  %v859_v17 = vld [vmem:[%s858_s23] sm:$0xf]  ;;  %v1299_v55 = vld [vmem:[%s1903_s15 + $0x38] sm:$0xff] (%p789_p0)  ;;  %v1298_v56 = vld [vmem:[%s1903_s15 + $0x30] sm:$0xff] (%p789_p0)  ;;  %s1281_s29 = sshll.u32 (%p789_p0), %s1655_s28, 3  ;;  %s1097_s0 = sshll.u32 (%p789_p0), %s571_s26, 4  ;;  %s1098_s0 = int_to_ptr.vmem [resolvable:$true] %s1097_s0 }
 0x24d   : >> { %v864_v18 = vsel %vm836_vm8, %v859_v17, 0  ;;  %v1388_v30 = vld [vmem:[%s1904_s16] ss:$0 sm:$0xff] (%p789_p0)  ;;  %v1291_v38 = vld [vmem:[#allocation9 + $0x8] sm:$0xff] (%p789_p0)  ;;  %v1295_v0 = vld [vmem:[%s1903_s15 + $0x18] sm:$0xff] (%p789_p0)  ;;  %s1095_s24 = scalar_lea.hbm (%p789_p0), %s1905_s17, %s1281_s29  ;;  %s1085_s28 = scalar_lea.sflag (%p789_p0), [#allocation8], %s569_s30 }
 0x24e   : >> { %v801_v8 = vld [vmem:[%s800_s21] sm:$0xf]  ;;  %873 = vmatpush.bf16.msra.mxu2 %v864_v18  ;;  %v1297_v58 = vld [vmem:[%s1903_s15 + $0x28] sm:$0xff] (%p789_p0)  ;;  %s1099_s27 = sshll.u32 (%p789_p0), %s1095_s24, 4  ;;  %s1476_s22 = scalar_lea.hbm (%p789_p0), %s1905_s17, 16  ;;  %s1100_s27 = int_to_ptr.hbm [resolvable:$true] %s1099_s27 }
 0x24f   : >> { %v838_v9 = vsel %vm836_vm8, %v801_v8, 0  ;;  %v1290_v39 = vld [vmem:[#allocation9] sm:$0xff] (%p789_p0)  ;;  %s1470_s19 = sshra.s32 (%p789_p0), %s1100_s27, 4  ;;  %s1471_s19 = int_to_ptr.hbm [resolvable:$true] %s1470_s19 }
 0x250   : >> { %847 = vmatpush.bf16.msra.mxu1 %v838_v9  ;;  %v1389_v49 = vld [vmem:[%s1899_s11] ss:$0 sm:$0xff] (%p789_p0)  ;;  %v1293_v9 = vld [vmem:[%s1903_s15 + $0x8] sm:$0xff] (%p789_p0)  ;;  %s1472_s20 = scalar_lea.hbm (%p789_p0), %s1471_s19, 8  ;;  %p1477_p4 = scmp.lt.s32.totalorder (%p789_p0), %s1471_s19, %s1905_s17 }
 0x251   : > { %v1391_v57 = vld [vmem:[%s1902_s14] ss:$0 sm:$0xff] (%p789_p0)  ;;  %p1473_p1 = scmp.ne.s32.totalorder (%p789_p0), %s1471_s19, %s1472_s20  ;;  %p1478_p7 = scmp.lt.s32.totalorder (%p789_p0), %s1476_s22, %s1472_s20 }
 0x252   : > { %v1296_v61 = vld [vmem:[%s1903_s15 + $0x20] sm:$0xff] (%p789_p0) }
 0x253   : >> { %1234 = vmatmul.msk.bf16.vlgmr.msra.gmra.mxu0 %vm802_vm7, %v795_v3  ;;  %p1474_p2 = pnand (%p789_p0), %p1473_p1, %p1672_p5  ;;  %p1479_p8 = por (%p789_p0), %p1478_p7, %p1477_p4 }
 0x254   : > { %950 = vmatpush.bf16.msra.mxu0 (%p789_p0), %v1291_v38 }
 0x255   : > { %p1475_p3 = pneg (%p789_p0), %p1474_p2 }
 0x257   : > { %p1480_p9 = pnand (%p789_p0), %p1479_p8, %p1475_p3 }
 0x258   : > { %951 = vmatpush.bf16.msra.mxu0 (%p789_p0), %v1290_v39 }
 0x2d0   : >> { %v818_v4 = vpop.f32.mrf.mxu0 }
 0x2d1   : >> { %v822_v5 = vsel %vm780_vm6, %v818_v4, -1e+30  ;;  %v1294_v4 = vld [vmem:[%s1903_s15 + $0x10] sm:$0xff] (%p789_p0) }
 0x2d2   : >> { %v823_v6 = vsel %vm802_vm7, %v822_v5, -inf }
 0x2d3   : >> { %824 = vmax.xlane.f32.xlu0 %v823_v6 }
 0x2d8   : >> { %v820_v7 = vpop.f32.mrf.mxu0 }
 0x346   : >> { %v825_v11 = vpop.xlane.xlu0 %824 }
 0x347   : >> { %v826_v12 = vsub.f32 %v822_v5, %v825_v11 }
 0x349   : >> { %v827_v13 = vmul.f32 1.442695, %v826_v12 }
 0x34b   : >> { %1384 = vpow2.f32 %v827_v13 }
 0x351   : >> { %v1385_v14 = vpop.eup %1384 }
 0x352   : >> { %v829_v15 = vsel %vm802_vm7, %v1385_v14, 0.0  ;;  %v832_v16 = vpack.c.bf16 %v1385_v14, %v1385_v14  ;;  %v1292_v14 = vld [vmem:[%s1903_s15] sm:$0xff] (%p789_p0) }
 0x353   : >> { %830 = vadd.xlane.f32.xlu0 %v829_v15 }
 0x354   : >> { %1235 = vmatmul.msk.bf16.vlgmr.msra.gmra.mxu1 %vm802_vm7, %v832_v16 }
 0x355   : > { %1067 = vmatpush.bf16.msra.mxu1 (%p789_p0), %v1299_v55 }
 0x359   : > { %1068 = vmatpush.bf16.msra.mxu1 (%p789_p0), %v1298_v56 }
 0x35d   : > { %1069 = vmatpush.bf16.msra.mxu1 (%p789_p0), %v1297_v58 }
 0x361   : > { %1070 = vmatpush.bf16.msra.mxu1 (%p789_p0), %v1296_v61 }
 0x365   : > { %1071 = vmatpush.bf16.msra.mxu1 (%p789_p0), %v1295_v0 }
 0x369   : > { %1072 = vmatpush.bf16.msra.mxu1 (%p789_p0), %v1294_v4 }
 0x36d   : > { %1073 = vmatpush.bf16.msra.mxu1 (%p789_p0), %v1293_v9 }
 0x371   : > { %1074 = vmatpush.bf16.msra.mxu1 (%p789_p0), %v1292_v14 }
 0x3c6   : >> { %v831_v19 = vpop.xlane.xlu0 %830 }
 0x3c7   : >> { %1386 = vrcp.f32 %v831_v19 }
 0x3cd   : >> { %v1387_v20 = vpop.eup %1386 }
 0x3d1   : >> { %v849_v21 = vpop.f32.mrf.mxu1 }
 0x3d2   : >> { %v854_v22 = vmul.f32 %v1387_v20, %v849_v21 }
 0x3d4   : >> { %v855_v23 = vpack.c.bf16 %v854_v22, %v854_v22 }
 0x3d6   : >> { %1237 = vmatmul.msk.bf16.vlgmr.msra.gmra.mxu2 %vm802_vm7, %v855_v23 }
 0x3d9   : >> { %v851_v24 = vpop.f32.mrf.mxu1 }
 0x459   : >> { %v875_v26 = vpop.f32.mrf.mxu2 }
 0x45a   : >> { %v879_v27 = vadd.f32 %v875_v26, %v856_v25 }
 0x45c   : >> { %880 = vst.msk [vmem:[#allocation5] sm:$0xff] %vm578_vm0, %v879_v27 }
 0x461   : >> { %v877_v28 = vpop.f32.mrf.mxu2  ;;  %791 = sbr.rel (!%p789_p0) target bundleno = 584 (0x248), region = 152 }
 0x463   : > { %v881_v29 = vld [vmem:[#allocation5] sm:$0xff] (%p789_p0) }
 0x464   : > { %v882_v31 = vsel (%p789_p0), %vm578_vm0, %v881_v29, 0.0  ;;  %v919_v32 = vadd.f32 (%p789_p0), %v1388_v30, %v881_v29 }
 0x465   : > { %883 = vadd.xlane.f32.xlu0 (%p789_p0), %v882_v31 }
 0x466   : > { %920 = vst.msk [vmem:[#allocation5] sm:$0xff] %vm578_vm0, %v919_v32 }
 0x4d8   : > { %v884_v33 = vpop.xlane.xlu0 %883 }
 0x4d9   : > { %v885_v34 = vmul.f32 %v884_v33, %v1717_v10 }
 0x4db   : > { %v886_v35 = vsub.f32 %v881_v29, %v885_v34 }
 0x4dd   : > { %v887_v36 = vmul.f32 %v886_v35, %v886_v35 }
 0x4df   : > { %v888_v37 = vsel %vm578_vm0, %v887_v36, 0.0 }
 0x4e0   : > { %889 = vadd.xlane.f32.xlu0 %v888_v37 }
 0x553   : > { %v890_v40 = vpop.xlane.xlu0 %889 }
 0x554   : > { %v891_v41 = vmul.f32 %v890_v40, %v1717_v10  ;;  %v1390_v10 = vld [vmem:[%s1900_s12] ss:$0 sm:$0xff] }
 0x556   : > { %v892_v42 = vadd.f32 1e-05, %v891_v41 }
 0x558   : > { %1392 = vrsqrt.f32 %v892_v42  ;;  %vm899_vm10 = vweird.f32 %v892_v42 }
 0x55e   : > { %v1393_v43 = vpop.eup %1392 }
 0x55f   : > { %v894_v44 = vmul.f32 %v1393_v43, %v892_v42  ;;  %vm900_vm9 = vweird.f32 %v1393_v43 }
 0x560   : > { %vm901_vm11 = vmor %vm899_vm10, %vm900_vm9 }
 0x561   : > { %v895_v45 = vmul.f32 %v1393_v43, %v894_v44  ;;  %v1001_v44 = vld [vmem:[#allocation5] sm:$0xff] }
 0x563   : > { %v896_v46 = vmul.f32 0.5, %v895_v45 }
 0x565   : > { %v897_v47 = vsub.f32 1.5, %v896_v46 }
 0x567   : > { %v898_v48 = vmul.f32 %v1393_v43, %v897_v47 }
 0x569   : > { %v902_v50 = vsel %vm901_vm11, %v1393_v43, %v898_v48 }
 0x56a   : > { %v903_v51 = vmul.f32 %v902_v50, %v886_v35 }
 0x56c   : > { %v908_v52 = vmul.f32 %v1389_v49, %v903_v51 }
 0x56e   : > { %v913_v53 = vadd.f32 %v1390_v10, %v908_v52 }
 0x570   : > { %v914_v54 = vpack.c.bf16 %v913_v53, %v913_v53 }
 0x572   : > { %1246 = vmatmul.msk.bf16.vlgmr.msra.gmra.mxu0 %vm578_vm0, %v914_v54 }
 0x5ef   : > { %v953_v59 = vpop.f32.mrf.mxu0 }
 0x5f0   : > { %v954_v60 = vadd.f32 %v1391_v57, %v953_v59 }
 0x5f2   : > { %v958_v62 = vmul.f32 0.70710677, %v954_v60  ;;  %v957_v40 = vmul.f32 0.5, %v954_v60 }
 0x5f4   : > { %v959_v63 = vmul.f32 %v958_v62, %v958_v62 }
 0x5f6   : > { %v960_v1 = vmin.f32 %v959_v63, 16.0 }
 0x5f7   : > { %v955_v2 = vpop.f32.mrf.mxu0 }
 0x5f8   : > { %v961_v3 = vmul.f32 2.1237322e-06, %v960_v1  ;;  %v972_v5 = vmul.f32 3.8918573e-05, %v960_v1 }
 0x5fa   : > { %v962_v6 = vadd.f32 0.00028619796, %v961_v3  ;;  %v973_v7 = vadd.f32 0.001143296, %v972_v5 }
 0x5fc   : > { %v963_v8 = vmul.f32 %v962_v6, %v960_v1  ;;  %v974_v11 = vmul.f32 %v973_v7, %v960_v1 }
 0x5fe   : > { %v975_v12 = vadd.f32 0.014752088, %v974_v11  ;;  %v964_v13 = vadd.f32 0.0036580483, %v963_v8 }
 0x600   : > { %v976_v15 = vmul.f32 %v975_v12, %v960_v1  ;;  %v965_v17 = vmul.f32 %v964_v13, %v960_v1 }
 0x602   : > { %v977_v16 = vadd.f32 0.112945676, %v976_v15  ;;  %v966_v20 = vadd.f32 0.05243302, %v965_v17 }
 0x604   : > { %v978_v18 = vmul.f32 %v977_v16, %v960_v1  ;;  %v967_v23 = vmul.f32 %v966_v20, %v960_v1 }
 0x606   : > { %v979_v19 = vadd.f32 0.4994258, %v978_v18  ;;  %v968_v24 = vadd.f32 0.18741608, %v967_v23 }
 0x608   : > { %v980_v21 = vmul.f32 %v979_v19, %v960_v1  ;;  %v969_v26 = vmul.f32 %v968_v24, %v960_v1 }
 0x60a   : > { %v981_v22 = vadd.f32 1.0, %v980_v21  ;;  %v970_v30 = vadd.f32 1.1283791, %v969_v26 }
 0x60c   : > { %1394 = vrcp.f32 %v981_v22  ;;  %v993_v29 = vand.u32 2147483648, %v981_v22  ;;  %v991_v32 = vand.u32 2147483647, %v981_v22  ;;  %vm987_vm13 = vweird.f32 %v981_v22 }
 0x60d   : > { %v971_v35 = vmul.f32 %v970_v30, %v958_v62 }
 0x60e   : > { %v994_v34 = vor.u32 1.1754944e-38, %v993_v29  ;;  %vm992_vm15 = vcmp.eq.f32.partialorder %v991_v32, 8.507059e+37 }
 0x612   : > { %v1395_v25 = vpop.eup %1394 }
 0x613   : > { %v983_v27 = vmul.f32 %v1395_v25, %v981_v22  ;;  %vm988_vm12 = vweird.f32 %v1395_v25 }
 0x614   : > { %vm989_vm14 = vmor %vm987_vm13, %vm988_vm12 }
 0x615   : > { %v984_v28 = vsub.f32 1.0, %v983_v27 }
 0x617   : > { %v985_v31 = vmul.f32 %v1395_v25, %v984_v28 }
 0x619   : > { %v986_v33 = vadd.f32 %v1395_v25, %v985_v31 }
 0x61b   : > { %v990_v36 = vsel %vm989_vm14, %v1395_v25, %v986_v33 }
 0x61c   : > { %v995_v37 = vsel %vm992_vm15, %v994_v34, %v990_v36 }
 0x61d   : > { %v996_v38 = vmul.f32 %v995_v37, %v971_v35 }
 0x61f   : > { %v1247_v39 = vclamps-f32 %v996_v38, 1.0 }
 0x621   : > { %v999_v41 = vadd.f32 1.0, %v1247_v39 }
 0x623   : > { %v1000_v42 = vmul.f32 %v999_v41, %v957_v40 }
 0x625   : > { %v1002_v43 = vpack.c.bf16 %v1000_v42, %v1000_v42 }
 0x627   : > { %1075 = vmatmul.bf16.vlgmr.msra.gmra.mxu1 %v1002_v43 }
 0x6a4   : > { %v1076_v45 = vpop.f32.mrf.mxu1 }
 0x6a5   : > { %v1080_v46 = vadd.f32 %v1076_v45, %v1001_v44 }
 0x6a7   : > { %1081 = vst.msk [vmem:[#allocation5] sm:$0xff] %vm578_vm0, %v1080_v46 }
 0x6ac   : > { %v1078_v47 = vpop.f32.mrf.mxu1 }
 0x6ae   : > { %v1082_v48 = vld [vmem:[#allocation5] sm:$0xff] }
 0x6af   : > { %1083 = vst.msk [vmem:[%s571_s26] sm:$0xff] %vm578_vm0, %v1082_v48 }
 0x6b0   : > { %1483 = shalt.err (!%p1480_p9)
}
 0x6b1   : > { %1308 = dma.vmem_to_hbm [thread:$0]  (%p1672_p5), %s1098_s0, 128, %s1100_s27, %s1085_s28  }
 0x6b2 PF: > { %s1927_s30 = sld [smem:[#allocation17_spill]] }
 0x6b3   : > { %s1928_s18 = sld [smem:[#allocation15_spill]] }
 0x6b8   : > { %p1325_p10 = scmp.ge.s32.totalorder %s1927_s30, 2 }
 0x6b9   : > { %s1111_s2 = sand.u32 1, %s1928_s18  }
 0x6ba   : > { %p1318_p11 = pnand %p1325_p10, %p1676_p6  ;;  %s1112_s21 = scalar_lea.sflag [#allocation8], %s1111_s2 }
 0x6bc   : > { %p1319_p12 = pneg %p1318_p11 }
 0x6be   : > { %1513 = dma.done.wait (%p1319_p12), %s1112_s21, 128  }
 0x6bf   : > { %1515 = vsyncadd (%p1319_p12), %s1112_s21, 4294967168  ;;  %s1930_s27 = sld [smem:[#allocation18_spill]]  ;;  %s1933_s24 = smov %s1522_s25 }
 0x6c0   : > { %s1931_s19 = sld [smem:[#allocation16_spill]] }
 0x6c1   : > { %s1932_s26 = sld [smem:[#allocation19_spill]] }
 0x6c5   : > { %p29_p13 = scmp.ge.s32.totalorder %s1930_s27, 4  }
 0x6c6   : > { %s1934_s25 = smov %s1931_s19 }
 0x6c7   :  { %31 = sbr.rel (!%p29_p13) target bundleno = 9 (0x9), region = 163 }
 0x6cc   :  { %1118 = vsyncpa [#allocation7], 1 }
 0x6cd   :  { %1120 = vsyncpa [#allocation7 + $0x1], 1 }
 0x6ce   :  { %1121 = vsyncpa [#allocation10], 1 }
 0x6cf   :  { %1122 = vsyncpa [#allocation8], 1 }
 0x6d0   :  { %1124 = vsyncpa [#allocation8 + $0x1], 1 }

// kernel: tpu_custom_call.1
= control target key start
LH: loop header
LB: loop body
LE: loop exit
PB: predicated region body
PF: predicated region fallthrough
CT: control target
= control target key end

     0   :  { %s1888_s0 = inlined_call_operand.vmem [shape: f32[2,8,32], index: 0, kind: input, shape index: {}]   ;;  %s1889_s1 = inlined_call_operand.hbm [shape: f32[1,32], index: 1, kind: input, shape index: {}]   ;;  %s1890_s2 = inlined_call_operand.vmem [shape: f32[1,32], index: 2, kind: input, shape index: {}]   ;;  %s1891_s3 = inlined_call_operand.vmem [shape: bf16[32,32], index: 3, kind: input, shape index: {}]   ;;  %s1892_s4 = inlined_call_operand.vmem [shape: f32[1,32], index: 4, kind: input, shape index: {}]   ;;  %s1893_s5 = inlined_call_operand.vmem [shape: bf16[32,32], index: 5, kind: input, shape index: {}]   ;;  %s1894_s6 = inlined_call_operand.vmem [shape: f32[1,32], index: 6, kind: input, shape index: {}]   ;;  %s1895_s7 = inlined_call_operand.vmem [shape: bf16[32,32], index: 7, kind: input, shape index: {}]   ;;  %s1896_s8 = inlined_call_operand.vmem [shape: f32[1,32], index: 8, kind: input, shape index: {}]   ;;  %s1897_s9 = inlined_call_operand.vmem [shape: bf16[4,8,32], index: 9, kind: input, shape index: {}]   ;;  %s1898_s10 = inlined_call_operand.vmem [shape: f32[1,32], index: 10, kind: input, shape index: {}]   ;;  %s1899_s11 = inlined_call_operand.vmem [shape: f32[1,32], index: 11, kind: input, shape index: {}]   ;;  %s1900_s12 = inlined_call_operand.vmem [shape: f32[1,32], index: 12, kind: input, shape index: {}]   ;;  %s1901_s13 = inlined_call_operand.hbm [shape: bf16[1,32,128], index: 13, kind: input, shape index: {}]   ;;  %s1902_s14 = inlined_call_operand.vmem [shape: f32[1,1,128], index: 14, kind: input, shape index: {}]   ;;  %s1903_s15 = inlined_call_operand.vmem [shape: bf16[1,128,32], index: 15, kind: input, shape index: {}]   ;;  %s1904_s16 = inlined_call_operand.vmem [shape: f32[1,32], index: 16, kind: input, shape index: {}]   ;;  %s1905_s17 = inlined_call_operand.hbm [shape: f32[2,8,32], index: 17, kind: output, shape index: {}]  }
   0x1   :  { %1912 = sst [smem:[#allocation21_spill]] %s1888_s0 }
   0x2   :  { %1913 = sst [smem:[#allocation22_spill]] %s1889_s1 }
   0x3   :  { %1914 = sst [smem:[#allocation23_spill]] %s1890_s2 }
   0x4   :  { %22 = vsyncpa [#allocation7], 0 }
   0x5   :  { %23 = vsyncpa [#allocation10], 0 }
   0x6   :  { %24 = vsyncpa [#allocation8], 0 }
   0x7   :  { %26 = vsyncpa [#allocation8 + $0x1], 0  ;;  %s1634_s24 = smov 0   ;;  %s1636_s25 = smov 0  }
   0x8   :  { %s1638_s26 = smov 0   ;;  %s1640_s27 = smov 0  }
   0x9 LB: > { %1915 = sst [smem:[#allocation15_spill]] %s1518_s24  ;;  %s1655_s28 = sadd.s32 4294967295, %s1530_s27   ;;  %s1530_s27 = sphi %s1640_s27, %s1930_s27   ;;  %s1526_s26 = sphi %s1638_s26, %s1932_s26   ;;  %s1522_s25 = sphi %s1636_s25, %s1934_s25   ;;  %s1518_s24 = sphi %s1634_s24, %s1933_s24  }
   0xa   : > { %1916 = sst [smem:[#allocation16_spill]] %s1526_s26  ;;  %s1194_s29 = sadd.s32 4294967294, %s1530_s27  }
   0xb   : > { %1917 = sst [smem:[#allocation17_spill]] %s1530_s27  ;;  %s1659_s0 = sadd.s32 1, %s1530_s27  }
   0xc   : > { %1918 = sst [smem:[#allocation18_spill]] %s1659_s0  ;;  %s401_s30 = sadd.s32 1, %s1526_s26 }
   0xd   : > { %s398_s18 = ssub.s32 %s1530_s27, %s1659_s0  ;;  %p411_p0 = scmp.ne.s32.totalorder %s1526_s26, %s1522_s25 }
   0xe   : > { %p399_p1 = scmp.eq.s32.totalorder %s398_s18, 0  ;;  %p412_p2 = scmp.eq.s32.totalorder %s1655_s28, 1 }
   0xf   : > { %p417_p3 = scmp.ne.s32.totalorder %s1522_s25, %s1518_s24  ;;  %p418_p4 = scmp.eq.s32.totalorder %s1194_s29, 1 }
  0x10   : > { %s1670_s19 = scalar_select %p399_p1, %s1526_s26, %s401_s30  }
  0x11   : > { %p1672_p5 = por %p412_p2, %p411_p0  ;;  %p1676_p6 = por %p418_p4, %p417_p3 }
  0x12   : > { %1919 = sst [smem:[#allocation19_spill]] %s1670_s19  ;;  %p1195_p7 = scmp.ge.s32.totalorder %s1530_s27, 1 }
  0x13   : > { %s1921_s20 = scalar_select %p1676_p6, 1, 0 }
  0x14   : > { %p425_p8 = scmp.lt.s32.totalorder %s1530_s27, 3  ;;  %p1321_p9 = scmp.eq.s32.totalorder %s1655_s28, 0 }
  0x15   : > { %1922 = sst [smem:[#allocation20_spill]] %s1921_s20  ;;  %s1536_s18 = smov [#allocation6]  }
  0x16   : > { %p1683_p10 = pnand %p1195_p7, %p425_p8  ;;  %s1924_s29 = sld [smem:[#allocation22_spill]] }
  0x17   : > { %s439_s19 = sshll.u32 %s1536_s18, 4  ;;  %s481_s20 = sshll.u32 %s1901_s13, 4  ;;  %s440_s19 = int_to_ptr.vmem [resolvable:$true] %s439_s19  ;;  %s482_s20 = int_to_ptr.hbm [resolvable:$true] %s481_s20 }
  0x18   : > { %p1310_p11 = pneg %p1683_p10  ;;  %s1537_s24 = smov [#allocation9]  }
  0x19   : > { %s483_s27 = sshll.u32 %s1537_s24, 4  ;;  %s1538_s22 = smov 64   ;;  %s484_s27 = int_to_ptr.vmem [resolvable:$true] %s483_s27 }
  0x1a   : > { %p1311_p12 = pnand %p1321_p9, %p1310_p11  ;;  %s1539_s23 = smov 4  }
  0x1b   : > { %515 = sbr.rel (%p1683_p10) target bundleno = 1714 (0x6b2), region = 88 }
  0x1c   : > { %s437_s30 = sshll.u32 %s1924_s29, 4  ;;  %s438_s30 = int_to_ptr.hbm [resolvable:$true] %s437_s30 }
  0x1d   : > { %1313 = dma.hbm_to_vmem [thread:$0]  (!%p1311_p12), %s438_s30, 16, %s440_s19, [#allocation7]  }
  0x1e   : > { %1316 = dma.hbm_to_vmem [thread:$0]  (!%p1311_p12), %s482_s20, 256, %s484_s27, [#allocation10], %s1538_s22, %s1538_s22, %s1539_s23  }
  0x20   : > { %1505 = dma.done.wait (%p1321_p9), [#allocation7], 16  }
  0x21   : > { %1507 = vsyncadd (%p1321_p9), [#allocation7], 4294967280 }
  0x22   : > { %1509 = dma.done.wait (%p1321_p9), [#allocation10], 256  }
  0x23   : > { %1511 = vsyncadd (%p1321_p9), [#allocation10], 4294967040  ;;  %p572_p13 = scmp.lt.s32.totalorder %s1655_s28, 1  ;;  %s1925_s19 = sld [smem:[#allocation21_spill]]  ;;  %vm578_vm0 = vcmask 261120   ;;  %v1540_v4 = vmov 32.0   ;;  %v776_v55 = vlaneseq }
  0x24   : > { %v1374_v1 = vld [vmem:[%s1898_s10] ss:$0 sm:$0xff]  ;;  %1380 = vrcp.f32 %v1540_v4  ;;  %s569_s30 = sand.u32 1, %s1522_s25   ;;  %v1285_v16 = vld [vmem:[%s1891_s3 + $0x8] sm:$0xff]  ;;  %v1375_v31 = vld [vmem:[#allocation6] ss:$0 sm:$0xff] }
  0x25   : > { %s573_s24 = scalar_select %p572_p13, %s1655_s28, 1  ;;  %v1287_v17 = vld [vmem:[%s1893_s5 + $0x8] sm:$0xff]  ;;  %648 = vmatpush.bf16.msra.mxu0 %v1285_v16  ;;  %v1284_v19 = vld [vmem:[%s1891_s3] sm:$0xff]  ;;  %vm656_vm5 = vcmask 60416   ;;  %v1766_v57 = vshrl.u32 %v776_v55, 7  ;;  %v1768_v58 = vand.u32 127, %v776_v55 }
  0x26   : > { %s1724_s18 = sshll.u32 %s569_s30, 3  ;;  %v1289_v18 = vld [vmem:[%s1895_s7 + $0x8] sm:$0xff]  ;;  %700 = vmatpush.bf16.msra.mxu1 %v1287_v17  ;;  %v1286_v20 = vld [vmem:[%s1893_s5] sm:$0xff]  ;;  %s1926_s2 = sld [smem:[#allocation23_spill]] }
  0x27   : > { %s1203_s26 = sshll.u32 %s573_s24, 3  ;;  %751 = vmatpush.bf16.msra.mxu2 %v1289_v18  ;;  %v1288_v21 = vld [vmem:[%s1895_s7] sm:$0xff]  ;;  %s1541_s22 = smov 112   ;;  %vm780_vm6 = vcmp.ge.s32.totalorder %v1766_v57, %v1768_v58 }
  0x28   : > { %v1377_v38 = vld [vmem:[%s1892_s4] ss:$0 sm:$0xff]  ;;  %s1542_s23 = smov 104   ;;  %s1543_s24 = smov 120  }
  0x29   : > { %s575_s20 = scalar_lea.vmem %s1925_s19, %s1203_s26  ;;  %649 = vmatpush.bf16.msra.mxu0 %v1284_v19  ;;  %v1378_v39 = vld [vmem:[%s1894_s6] ss:$0 sm:$0xff]  ;;  %s571_s26 = scalar_lea.vmem [#allocation11], %s1724_s18 }
  0x2a   : > { %v577_v0 = vld [vmem:[%s575_s20] sm:$0xff]  ;;  %v1381_v5 = vpop.eup %1380  ;;  %701 = vmatpush.bf16.msra.mxu1 %v1286_v20  ;;  %s1779_s27 = smov 0  }
  0x2b   : > { %v579_v2 = vsel %vm578_vm0, %v577_v0, 0.0  ;;  %v785_v3 = vadd.f32 %v1374_v1, %v577_v0  ;;  %v583_v6 = vmul.f32 32.0, %v1381_v5  ;;  %vm587_vm1 = vweird.f32 %v1381_v5  ;;  %752 = vmatpush.bf16.msra.mxu2 %v1288_v21  ;;  %v1379_v46 = vld [vmem:[%s1896_s8] ss:$0 sm:$0xff] }
  0x2c   : > { %580 = vadd.xlane.f32.xlu0 %v579_v2  ;;  %v1376_v34 = vld [vmem:[%s1926_s2] ss:$0 sm:$0xff] }
  0x2d   : > { %786 = vst.msk [vmem:[#allocation5] sm:$0xff] %vm578_vm0, %v785_v3  ;;  %v584_v7 = vsub.f32 1.0, %v583_v6 }
  0x2f   : > { %v585_v8 = vmul.f32 %v1381_v5, %v584_v7 }
  0x31   : > { %v586_v9 = vadd.f32 %v1381_v5, %v585_v8 }
  0x33   : > { %v1717_v10 = vsel %vm587_vm1, %v1381_v5, %v586_v9 }
  0x9f   : > { %v581_v11 = vpop.xlane.xlu0 %580 }
  0xa0   : > { %v589_v12 = vmul.f32 %v1717_v10, %v581_v11 }
  0xa2   : > { %v590_v13 = vsub.f32 %v577_v0, %v589_v12 }
  0xa4   : > { %v591_v14 = vmul.f32 %v590_v13, %v590_v13 }
  0xa6   : > { %v592_v15 = vsel %vm578_vm0, %v591_v14, 0.0 }
  0xa7   : > { %593 = vadd.xlane.f32.xlu0 %v592_v15 }
 0x11a   : > { %v594_v22 = vpop.xlane.xlu0 %593 }
 0x11b   : > { %v595_v23 = vmul.f32 %v594_v22, %v1717_v10 }
 0x11d   : > { %v596_v24 = vadd.f32 1e-05, %v595_v23 }
 0x11f   : > { %1382 = vrsqrt.f32 %v596_v24  ;;  %vm603_vm3 = vweird.f32 %v596_v24 }
 0x125   : > { %v1383_v25 = vpop.eup %1382 }
 0x126   : > { %v598_v26 = vmul.f32 %v1383_v25, %v596_v24  ;;  %vm604_vm2 = vweird.f32 %v1383_v25 }
 0x127   : > { %vm605_vm4 = vmor %vm603_vm3, %vm604_vm2 }
 0x128   : > { %v599_v27 = vmul.f32 %v1383_v25, %v598_v26 }
 0x12a   : > { %v600_v28 = vmul.f32 0.5, %v599_v27 }
 0x12c   : > { %v601_v29 = vsub.f32 1.5, %v600_v28 }
 0x12e   : > { %v602_v30 = vmul.f32 %v1383_v25, %v601_v29 }
 0x130   : > { %v606_v32 = vsel %vm605_vm4, %v1383_v25, %v602_v30 }
 0x131   : > { %v607_v33 = vmul.f32 %v606_v32, %v590_v13 }
 0x133   : > { %v612_v35 = vmul.f32 %v1375_v31, %v607_v33 }
 0x135   : > { %v617_v36 = vadd.f32 %v1376_v34, %v612_v35 }
 0x137   : > { %v618_v37 = vpack.c.bf16 %v617_v36, %v617_v36 }
 0x139   : > { %1212 = vmatmul.msk.bf16.vlgmr.msra.gmra.mxu0 %vm578_vm0, %v618_v37  ;;  %1221 = vmatmul.msk.bf16.vlgmr.msra.gmra.mxu1 %vm578_vm0, %v618_v37 }
 0x13a   : > { %1230 = vmatmul.msk.bf16.vlgmr.msra.gmra.mxu2 %vm578_vm0, %v618_v37 }
 0x1b6   : > { %v651_v40 = vpop.f32.mrf.mxu0  ;;  %v703_v41 = vpop.f32.mrf.mxu1 }
 0x1b7   : > { %v652_v42 = vadd.f32 %v1377_v38, %v651_v40  ;;  %v704_v43 = vadd.f32 %v1378_v39, %v703_v41 }
 0x1b9   : > { %v655_v44 = vpack.c.bf16 %v652_v42, %v652_v42  ;;  %v707_v45 = vpack.c.bf16 %v704_v43, %v704_v43 }
 0x1bb   : > { %657 = vst.msk [vmem:[#allocation2] sm:$0xf] %vm656_vm5, %v655_v44  ;;  %715 = vrot.lane.b32.xlu0 %v707_v45, %s1541_s22  ;;  %669 = vrot.lane.b32.xlu2 %v655_v44, %s1542_s23 }
 0x1bc   : > { %708 = vst.msk [vmem:[#allocation3] sm:$0xf] %vm656_vm5, %v707_v45  ;;  %659 = vrot.lane.b32.xlu1 %v655_v44, %s1543_s24 }
 0x1bd   : > { %v754_v47 = vpop.f32.mrf.mxu2 }
 0x1be   : > { %v755_v48 = vadd.f32 %v1379_v46, %v754_v47  ;;  %v653_v49 = vpop.f32.mrf.mxu0  ;;  %v705_v50 = vpop.f32.mrf.mxu1 }
 0x1c0   : > { %v758_v51 = vpack.c.bf16 %v755_v48, %v755_v48 }
 0x1c2   : > { %759 = vst.msk [vmem:[#allocation4] sm:$0xf] %vm656_vm5, %v758_v51 }
 0x1c3   : > { %710 = vrot.lane.b32.xlu2 %v707_v45, %s1543_s24 }
 0x1c4   : > { %664 = vrot.lane.b32.xlu1 %v655_v44, %s1541_s22 }
 0x1c5   : > { %v756_v52 = vpop.f32.mrf.mxu2 }
 0x1cb   : > { %761 = vrot.lane.b32.xlu2 %v758_v51, %s1543_s24 }
 0x1cc   : > { %720 = vrot.lane.b32.xlu1 %v707_v45, %s1542_s23 }
 0x1d3   : > { %771 = vrot.lane.b32.xlu2 %v758_v51, %s1542_s23 }
 0x1d4   : > { %766 = vrot.lane.b32.xlu1 %v758_v51, %s1541_s22 }
 0x215   : > { %v670_v53 = vpop.permute.xlu2 %669 }
 0x216   : > { %673 = vst.msk [vmem:[#allocation2 + $0xc] sm:$0xf] %vm656_vm5, %v670_v53 }
 0x21d   : > { %v711_v54 = vpop.permute.xlu2 %710 }
 0x21e   : > { %714 = vst.msk [vmem:[#allocation3 + $0x4] sm:$0xf] %vm656_vm5, %v711_v54 }
 0x225   : > { %v762_v56 = vpop.permute.xlu2 %761 }
 0x226   : > { %765 = vst.msk [vmem:[#allocation4 + $0x4] sm:$0xf] %vm656_vm5, %v762_v56 }
 0x22d   : > { %v716_v59 = vpop.permute.xlu0 %715  ;;  %v772_v60 = vpop.permute.xlu2 %771 }
 0x22e   : > { %719 = vst.msk [vmem:[#allocation3 + $0x8] sm:$0xf] %vm656_vm5, %v716_v59  ;;  %v660_v61 = vpop.permute.xlu1 %659 }
 0x22f   : > { %775 = vst.msk [vmem:[#allocation4 + $0xc] sm:$0xf] %vm656_vm5, %v772_v60 }
 0x230   : > { %663 = vst.msk [vmem:[#allocation2 + $0x4] sm:$0xf] %vm656_vm5, %v660_v61 }
 0x236   : > { %v665_v62 = vpop.permute.xlu1 %664 }
 0x237   : > { %668 = vst.msk [vmem:[#allocation2 + $0x8] sm:$0xf] %vm656_vm5, %v665_v62 }
 0x23e   : > { %v721_v63 = vpop.permute.xlu1 %720 }
 0x23f   : > { %724 = vst.msk [vmem:[#allocation3 + $0xc] sm:$0xf] %vm656_vm5, %v721_v63 }
 0x246   : > { %v767_v0 = vpop.permute.xlu1 %766 }
 0x247   : > { %770 = vst.msk [vmem:[#allocation4 + $0x8] sm:$0xf] %vm656_vm5, %v767_v0 }
 0x248 LB: >> { %s1785_s0 = sshll.u32 %s1534_s27, 2  ;;  %vm802_vm7 = vcmask 64512   ;;  %vm836_vm8 = vcmask 1043456   ;;  %v856_v25 = vld [vmem:[#allocation5] sm:$0xff]  ;;  %s792_s27 = sadd.s32 1, %s1534_s27   ;;  %s1534_s27 = sphi %s1779_s27, %s792_s27  }
 0x249   : >> { %s797_s19 = scalar_lea.vmem [#allocation3], %s1785_s0  ;;  %s794_s20 = scalar_lea.vmem [#allocation2], %s1785_s0 }
 0x24a   : >> { %v798_v1 = vld [vmem:[%s797_s19] sm:$0xf]  ;;  %s800_s21 = scalar_lea.vmem [#allocation4], %s1785_s0  ;;  %s858_s23 = scalar_lea.vmem %s1897_s9, %s1785_s0 }
 0x24b   : >> { %v807_v2 = vsel %vm802_vm7, %v798_v1, 0  ;;  %v795_v3 = vld [vmem:[%s794_s20] sm:$0xf]  ;;  %p789_p0 = scmp.ge.s32.totalorder %s792_s27, 4  }
 0x24c   : >> { %816 = vmatpush.bf16.xpose.msra.mxu0 %v807_v2  ;;  %v859_v17 = vld [vmem:[%s858_s23] sm:$0xf]  ;;  %v1299_v55 = vld [vmem:[%s1903_s15 + $0x38] sm:$0xff] (%p789_p0)  ;;  %v1298_v56 = vld [vmem:[%s1903_s15 + $0x30] sm:$0xff] (%p789_p0)  ;;  %s1281_s29 = sshll.u32 (%p789_p0), %s1655_s28, 3  ;;  %s1097_s0 = sshll.u32 (%p789_p0), %s571_s26, 4  ;;  %s1098_s0 = int_to_ptr.vmem [resolvable:$true] %s1097_s0 }
 0x24d   : >> { %v864_v18 = vsel %vm836_vm8, %v859_v17, 0  ;;  %v1388_v30 = vld [vmem:[%s1904_s16] ss:$0 sm:$0xff] (%p789_p0)  ;;  %v1291_v38 = vld [vmem:[#allocation9 + $0x8] sm:$0xff] (%p789_p0)  ;;  %v1295_v0 = vld [vmem:[%s1903_s15 + $0x18] sm:$0xff] (%p789_p0)  ;;  %s1095_s24 = scalar_lea.hbm (%p789_p0), %s1905_s17, %s1281_s29  ;;  %s1085_s28 = scalar_lea.sflag (%p789_p0), [#allocation8], %s569_s30 }
 0x24e   : >> { %v801_v8 = vld [vmem:[%s800_s21] sm:$0xf]  ;;  %873 = vmatpush.bf16.msra.mxu2 %v864_v18  ;;  %v1297_v58 = vld [vmem:[%s1903_s15 + $0x28] sm:$0xff] (%p789_p0)  ;;  %s1099_s27 = sshll.u32 (%p789_p0), %s1095_s24, 4  ;;  %s1476_s22 = scalar_lea.hbm (%p789_p0), %s1905_s17, 16  ;;  %s1100_s27 = int_to_ptr.hbm [resolvable:$true] %s1099_s27 }
 0x24f   : >> { %v838_v9 = vsel %vm836_vm8, %v801_v8, 0  ;;  %v1290_v39 = vld [vmem:[#allocation9] sm:$0xff] (%p789_p0)  ;;  %s1470_s19 = sshra.s32 (%p789_p0), %s1100_s27, 4  ;;  %s1471_s19 = int_to_ptr.hbm [resolvable:$true] %s1470_s19 }
 0x250   : >> { %847 = vmatpush.bf16.msra.mxu1 %v838_v9  ;;  %v1389_v49 = vld [vmem:[%s1899_s11] ss:$0 sm:$0xff] (%p789_p0)  ;;  %v1293_v9 = vld [vmem:[%s1903_s15 + $0x8] sm:$0xff] (%p789_p0)  ;;  %s1472_s20 = scalar_lea.hbm (%p789_p0), %s1471_s19, 8  ;;  %p1477_p4 = scmp.lt.s32.totalorder (%p789_p0), %s1471_s19, %s1905_s17 }
 0x251   : > { %v1391_v57 = vld [vmem:[%s1902_s14] ss:$0 sm:$0xff] (%p789_p0)  ;;  %p1473_p1 = scmp.ne.s32.totalorder (%p789_p0), %s1471_s19, %s1472_s20  ;;  %p1478_p7 = scmp.lt.s32.totalorder (%p789_p0), %s1476_s22, %s1472_s20 }
 0x252   : > { %v1296_v61 = vld [vmem:[%s1903_s15 + $0x20] sm:$0xff] (%p789_p0) }
 0x253   : >> { %1234 = vmatmul.msk.bf16.vlgmr.msra.gmra.mxu0 %vm802_vm7, %v795_v3  ;;  %p1474_p2 = pnand (%p789_p0), %p1473_p1, %p1672_p5  ;;  %p1479_p8 = por (%p789_p0), %p1478_p7, %p1477_p4 }
 0x254   : > { %950 = vmatpush.bf16.msra.mxu0 (%p789_p0), %v1291_v38 }
 0x255   : > { %p1475_p3 = pneg (%p789_p0), %p1474_p2 }
 0x257   : > { %p1480_p9 = pnand (%p789_p0), %p1479_p8, %p1475_p3 }
 0x258   : > { %951 = vmatpush.bf16.msra.mxu0 (%p789_p0), %v1290_v39 }
 0x2d0   : >> { %v818_v4 = vpop.f32.mrf.mxu0 }
 0x2d1   : >> { %v822_v5 = vsel %vm780_vm6, %v818_v4, -1e+30  ;;  %v1294_v4 = vld [vmem:[%s1903_s15 + $0x10] sm:$0xff] (%p789_p0) }
 0x2d2   : >> { %v823_v6 = vsel %vm802_vm7, %v822_v5, -inf }
 0x2d3   : >> { %824 = vmax.xlane.f32.xlu0 %v823_v6 }
 0x2d8   : >> { %v820_v7 = vpop.f32.mrf.mxu0 }
 0x346   : >> { %v825_v11 = vpop.xlane.xlu0 %824 }
 0x347   : >> { %v826_v12 = vsub.f32 %v822_v5, %v825_v11 }
 0x349   : >> { %v827_v13 = vmul.f32 1.442695, %v826_v12 }
 0x34b   : >> { %1384 = vpow2.f32 %v827_v13 }
 0x351   : >> { %v1385_v14 = vpop.eup %1384 }
 0x352   : >> { %v829_v15 = vsel %vm802_vm7, %v1385_v14, 0.0  ;;  %v832_v16 = vpack.c.bf16 %v1385_v14, %v1385_v14  ;;  %v1292_v14 = vld [vmem:[%s1903_s15] sm:$0xff] (%p789_p0) }
 0x353   : >> { %830 = vadd.xlane.f32.xlu0 %v829_v15 }
 0x354   : >> { %1235 = vmatmul.msk.bf16.vlgmr.msra.gmra.mxu1 %vm802_vm7, %v832_v16 }
 0x355   : > { %1067 = vmatpush.bf16.msra.mxu1 (%p789_p0), %v1299_v55 }
 0x359   : > { %1068 = vmatpush.bf16.msra.mxu1 (%p789_p0), %v1298_v56 }
 0x35d   : > { %1069 = vmatpush.bf16.msra.mxu1 (%p789_p0), %v1297_v58 }
 0x361   : > { %1070 = vmatpush.bf16.msra.mxu1 (%p789_p0), %v1296_v61 }
 0x365   : > { %1071 = vmatpush.bf16.msra.mxu1 (%p789_p0), %v1295_v0 }
 0x369   : > { %1072 = vmatpush.bf16.msra.mxu1 (%p789_p0), %v1294_v4 }
 0x36d   : > { %1073 = vmatpush.bf16.msra.mxu1 (%p789_p0), %v1293_v9 }
 0x371   : > { %1074 = vmatpush.bf16.msra.mxu1 (%p789_p0), %v1292_v14 }
 0x3c6   : >> { %v831_v19 = vpop.xlane.xlu0 %830 }
 0x3c7   : >> { %1386 = vrcp.f32 %v831_v19 }
 0x3cd   : >> { %v1387_v20 = vpop.eup %1386 }
 0x3d1   : >> { %v849_v21 = vpop.f32.mrf.mxu1 }
 0x3d2   : >> { %v854_v22 = vmul.f32 %v1387_v20, %v849_v21 }
 0x3d4   : >> { %v855_v23 = vpack.c.bf16 %v854_v22, %v854_v22 }
 0x3d6   : >> { %1237 = vmatmul.msk.bf16.vlgmr.msra.gmra.mxu2 %vm802_vm7, %v855_v23 }
 0x3d9   : >> { %v851_v24 = vpop.f32.mrf.mxu1 }
 0x459   : >> { %v875_v26 = vpop.f32.mrf.mxu2 }
 0x45a   : >> { %v879_v27 = vadd.f32 %v875_v26, %v856_v25 }
 0x45c   : >> { %880 = vst.msk [vmem:[#allocation5] sm:$0xff] %vm578_vm0, %v879_v27 }
 0x461   : >> { %v877_v28 = vpop.f32.mrf.mxu2  ;;  %791 = sbr.rel (!%p789_p0) target bundleno = 584 (0x248), region = 152 }
 0x463   : > { %v881_v29 = vld [vmem:[#allocation5] sm:$0xff] (%p789_p0) }
 0x464   : > { %v882_v31 = vsel (%p789_p0), %vm578_vm0, %v881_v29, 0.0  ;;  %v919_v32 = vadd.f32 (%p789_p0), %v1388_v30, %v881_v29 }
 0x465   : > { %883 = vadd.xlane.f32.xlu0 (%p789_p0), %v882_v31 }
 0x466   : > { %920 = vst.msk [vmem:[#allocation5] sm:$0xff] %vm578_vm0, %v919_v32 }
 0x4d8   : > { %v884_v33 = vpop.xlane.xlu0 %883 }
 0x4d9   : > { %v885_v34 = vmul.f32 %v884_v33, %v1717_v10 }
 0x4db   : > { %v886_v35 = vsub.f32 %v881_v29, %v885_v34 }
 0x4dd   : > { %v887_v36 = vmul.f32 %v886_v35, %v886_v35 }
 0x4df   : > { %v888_v37 = vsel %vm578_vm0, %v887_v36, 0.0 }
 0x4e0   : > { %889 = vadd.xlane.f32.xlu0 %v888_v37 }
 0x553   : > { %v890_v40 = vpop.xlane.xlu0 %889 }
 0x554   : > { %v891_v41 = vmul.f32 %v890_v40, %v1717_v10  ;;  %v1390_v10 = vld [vmem:[%s1900_s12] ss:$0 sm:$0xff] }
 0x556   : > { %v892_v42 = vadd.f32 1e-05, %v891_v41 }
 0x558   : > { %1392 = vrsqrt.f32 %v892_v42  ;;  %vm899_vm10 = vweird.f32 %v892_v42 }
 0x55e   : > { %v1393_v43 = vpop.eup %1392 }
 0x55f   : > { %v894_v44 = vmul.f32 %v1393_v43, %v892_v42  ;;  %vm900_vm9 = vweird.f32 %v1393_v43 }
 0x560   : > { %vm901_vm11 = vmor %vm899_vm10, %vm900_vm9 }
 0x561   : > { %v895_v45 = vmul.f32 %v1393_v43, %v894_v44  ;;  %v1001_v44 = vld [vmem:[#allocation5] sm:$0xff] }
 0x563   : > { %v896_v46 = vmul.f32 0.5, %v895_v45 }
 0x565   : > { %v897_v47 = vsub.f32 1.5, %v896_v46 }
 0x567   : > { %v898_v48 = vmul.f32 %v1393_v43, %v897_v47 }
 0x569   : > { %v902_v50 = vsel %vm901_vm11, %v1393_v43, %v898_v48 }
 0x56a   : > { %v903_v51 = vmul.f32 %v902_v50, %v886_v35 }
 0x56c   : > { %v908_v52 = vmul.f32 %v1389_v49, %v903_v51 }
 0x56e   : > { %v913_v53 = vadd.f32 %v1390_v10, %v908_v52 }
 0x570   : > { %v914_v54 = vpack.c.bf16 %v913_v53, %v913_v53 }
 0x572   : > { %1246 = vmatmul.msk.bf16.vlgmr.msra.gmra.mxu0 %vm578_vm0, %v914_v54 }
 0x5ef   : > { %v953_v59 = vpop.f32.mrf.mxu0 }
 0x5f0   : > { %v954_v60 = vadd.f32 %v1391_v57, %v953_v59 }
 0x5f2   : > { %v958_v62 = vmul.f32 0.70710677, %v954_v60  ;;  %v957_v40 = vmul.f32 0.5, %v954_v60 }
 0x5f4   : > { %v959_v63 = vmul.f32 %v958_v62, %v958_v62 }
 0x5f6   : > { %v960_v1 = vmin.f32 %v959_v63, 16.0 }
 0x5f7   : > { %v955_v2 = vpop.f32.mrf.mxu0 }
 0x5f8   : > { %v961_v3 = vmul.f32 2.1237322e-06, %v960_v1  ;;  %v972_v5 = vmul.f32 3.8918573e-05, %v960_v1 }
 0x5fa   : > { %v962_v6 = vadd.f32 0.00028619796, %v961_v3  ;;  %v973_v7 = vadd.f32 0.001143296, %v972_v5 }
 0x5fc   : > { %v963_v8 = vmul.f32 %v962_v6, %v960_v1  ;;  %v974_v11 = vmul.f32 %v973_v7, %v960_v1 }
 0x5fe   : > { %v975_v12 = vadd.f32 0.014752088, %v974_v11  ;;  %v964_v13 = vadd.f32 0.0036580483, %v963_v8 }
 0x600   : > { %v976_v15 = vmul.f32 %v975_v12, %v960_v1  ;;  %v965_v17 = vmul.f32 %v964_v13, %v960_v1 }
 0x602   : > { %v977_v16 = vadd.f32 0.112945676, %v976_v15  ;;  %v966_v20 = vadd.f32 0.05243302, %v965_v17 }
 0x604   : > { %v978_v18 = vmul.f32 %v977_v16, %v960_v1  ;;  %v967_v23 = vmul.f32 %v966_v20, %v960_v1 }
 0x606   : > { %v979_v19 = vadd.f32 0.4994258, %v978_v18  ;;  %v968_v24 = vadd.f32 0.18741608, %v967_v23 }
 0x608   : > { %v980_v21 = vmul.f32 %v979_v19, %v960_v1  ;;  %v969_v26 = vmul.f32 %v968_v24, %v960_v1 }
 0x60a   : > { %v981_v22 = vadd.f32 1.0, %v980_v21  ;;  %v970_v30 = vadd.f32 1.1283791, %v969_v26 }
 0x60c   : > { %1394 = vrcp.f32 %v981_v22  ;;  %v993_v29 = vand.u32 2147483648, %v981_v22  ;;  %v991_v32 = vand.u32 2147483647, %v981_v22  ;;  %vm987_vm13 = vweird.f32 %v981_v22 }
 0x60d   : > { %v971_v35 = vmul.f32 %v970_v30, %v958_v62 }
 0x60e   : > { %v994_v34 = vor.u32 1.1754944e-38, %v993_v29  ;;  %vm992_vm15 = vcmp.eq.f32.partialorder %v991_v32, 8.507059e+37 }
 0x612   : > { %v1395_v25 = vpop.eup %1394 }
 0x613   : > { %v983_v27 = vmul.f32 %v1395_v25, %v981_v22  ;;  %vm988_vm12 = vweird.f32 %v1395_v25 }
 0x614   : > { %vm989_vm14 = vmor %vm987_vm13, %vm988_vm12 }
 0x615   : > { %v984_v28 = vsub.f32 1.0, %v983_v27 }
 0x617   : > { %v985_v31 = vmul.f32 %v1395_v25, %v984_v28 }
 0x619   : > { %v986_v33 = vadd.f32 %v1395_v25, %v985_v31 }
 0x61b   : > { %v990_v36 = vsel %vm989_vm14, %v1395_v25, %v986_v33 }
 0x61c   : > { %v995_v37 = vsel %vm992_vm15, %v994_v34, %v990_v36 }
 0x61d   : > { %v996_v38 = vmul.f32 %v995_v37, %v971_v35 }
 0x61f   : > { %v1247_v39 = vclamps-f32 %v996_v38, 1.0 }
 0x621   : > { %v999_v41 = vadd.f32 1.0, %v1247_v39 }
 0x623   : > { %v1000_v42 = vmul.f32 %v999_v41, %v957_v40 }
 0x625   : > { %v1002_v43 = vpack.c.bf16 %v1000_v42, %v1000_v42 }
 0x627   : > { %1075 = vmatmul.bf16.vlgmr.msra.gmra.mxu1 %v1002_v43 }
 0x6a4   : > { %v1076_v45 = vpop.f32.mrf.mxu1 }
 0x6a5   : > { %v1080_v46 = vadd.f32 %v1076_v45, %v1001_v44 }
 0x6a7   : > { %1081 = vst.msk [vmem:[#allocation5] sm:$0xff] %vm578_vm0, %v1080_v46 }
 0x6ac   : > { %v1078_v47 = vpop.f32.mrf.mxu1 }
 0x6ae   : > { %v1082_v48 = vld [vmem:[#allocation5] sm:$0xff] }
 0x6af   : > { %1083 = vst.msk [vmem:[%s571_s26] sm:$0xff] %vm578_vm0, %v1082_v48 }
 0x6b0   : > { %1483 = shalt.err (!%p1480_p9)
}
 0x6b1   : > { %1308 = dma.vmem_to_hbm [thread:$0]  (%p1672_p5), %s1098_s0, 128, %s1100_s27, %s1085_s28  }
 0x6b2 PF: > { %s1927_s30 = sld [smem:[#allocation17_spill]] }
 0x6b3   : > { %s1928_s18 = sld [smem:[#allocation15_spill]] }
 0x6b8   : > { %p1325_p10 = scmp.ge.s32.totalorder %s1927_s30, 2 }
 0x6b9   : > { %s1111_s2 = sand.u32 1, %s1928_s18  }
 0x6ba   : > { %p1318_p11 = pnand %p1325_p10, %p1676_p6  ;;  %s1112_s21 = scalar_lea.sflag [#allocation8], %s1111_s2 }
 0x6bc   : > { %p1319_p12 = pneg %p1318_p11 }
 0x6be   : > { %1513 = dma.done.wait (%p1319_p12), %s1112_s21, 128  }
 0x6bf   : > { %1515 = vsyncadd (%p1319_p12), %s1112_s21, 4294967168  ;;  %s1930_s27 = sld [smem:[#allocation18_spill]]  ;;  %s1933_s24 = smov %s1522_s25 }
 0x6c0   : > { %s1931_s19 = sld [smem:[#allocation16_spill]] }
 0x6c1   : > { %s1932_s26 = sld [smem:[#allocation19_spill]] }
 0x6c5   : > { %p29_p13 = scmp.ge.s32.totalorder %s1930_s27, 4  }
 0x6c6   : > { %s1934_s25 = smov %s1931_s19 }
 0x6c7   :  { %31 = sbr.rel (!%p29_p13) target bundleno = 9 (0x9), region = 163 }
 0x6cc   :  { %1118 = vsyncpa [#allocation7], 1 }
 0x6cd   :  { %1120 = vsyncpa [#allocation7 + $0x1], 1 }
 0x6ce   :  { %1121 = vsyncpa [#allocation10], 1 }
 0x6cf   :  { %1122 = vsyncpa [#allocation8], 1 }
 0x6d0   :  { %1124 = vsyncpa [#allocation8 + $0x1], 1 }

</bundles_post_ra>
